<compile_context>
chip_gen: v7x
topology: tpu7x:2x2x1
jax: 0.10.0
libtpu: 0.0.40
codegen_flags: <defaults>
</compile_context>

<pallas_src>
import functools

import numpy as np

import jax
import jax.numpy as jnp
from jax import lax
from jax.experimental import pallas as pl
from jax.experimental.pallas import tpu as pltpu

# contract lhs axis 0 with rhs axis 0  ==  lhs.T @ rhs  (no transposed copies)
_DN_T = (((0,), (0,)), ((), ()))


def _ham_kernel(
    # scalar prefetch (SMEM)
    nv_ref,                                   # (n_mol,) int32: valid vertices per molecule
    # per-molecule blocks (VMEM)
    v_ref, e_ref, m_ref, vew1_ref, vew2_ref,
    # fused params (VMEM, constant index -> fetched once)
    w_v2_ref, w_dst_ref, w_e2_ref, b_e2_ref, w_pq_ref, b_pq_ref, bg_ref,
    # outputs
    pq_out, stats_out,
    *, layers, tau, dissipate, pq_dim):
  f32 = jnp.float32
  mol = pl.program_id(0)
  n_valid = nv_ref[mol]                                   # int32 scalar

  v = v_ref[...]                                          # (TV, n_dim)
  e = e_ref[...]                                          # (TE, e_dim)
  vew1 = vew1_ref[...]                                    # (TV, TE)
  vew2 = vew2_ref[...]                                    # (TV, TE)
  tv = v.shape[0]

  inv_m = 1.0 / m_ref[...]                                # exact (no approx recip on mass)
  row_id = lax.broadcasted_iota(jnp.int32, (tv, 1), 0)
  vmask = (row_id < n_valid).astype(f32)                  # (TV, 1) valid-vertex mask

  # ---- edge gate + stiffness heads (re-associated; no src_v, no lane concat) ---------
  node2 = jnp.dot(v, w_v2_ref[...], preferred_element_type=f32)        # (TV,2): [src gate | gamma logit]
  dst_v = lax.dot_general(vew2, v, _DN_T, preferred_element_type=f32)  # (TE, n_dim) reused by pq encoder
  gate_src = lax.dot_general(vew1, node2[:, 0:1], _DN_T,
                             preferred_element_type=f32)               # (TE, 1)
  gate_dst = jnp.dot(dst_v, w_dst_ref[...], preferred_element_type=f32)  # (TE, 1)
  e_head = jnp.dot(e, w_e2_ref[...], preferred_element_type=f32) + b_e2_ref[...]  # (TE,2)
  e_weight = jax.nn.sigmoid(e_head[:, 0:1] + gate_src + gate_dst)      # (TE, 1) edge gate
  c = jax.nn.softplus(e_head[:, 1:2])                                  # (TE, 1) stiffness

  gamma = jax.nn.sigmoid(node2[:, 1:2] + bg_ref[...])                  # (TV, 1) friction

  # ---- pq encoder (linear variant, config['LSTM']=False, disturb=False) --------------
  # TODO(synk): LstmPQEncoder source not provided; LSTM branch replaced by a linear
  # encoder over one e-weighted message-passing step with per-molecule centering of q.
  msg = jnp.dot(vew1, e_weight * dst_v, preferred_element_type=f32)    # adj@v, re-associated
  pq0 = jnp.dot(v + msg, w_pq_ref[...], preferred_element_type=f32) + b_pq_ref[...]
  p0 = pq0[:, :pq_dim] * vmask
  q0 = pq0[:, pq_dim:] * vmask
  inv_cnt = 1.0 / jnp.maximum(n_valid.astype(f32), 1.0)                # exact
  mean_q = jnp.sum(q0, axis=0, keepdims=True) * inv_cnt                # (1, pq)
  q0 = (q0 - mean_q) * vmask

  # signed incidence; per-molecule block -> small temp (not graph-sized)
  b_inc = vew1 - vew2

  # ---- DissipativeHamiltonianDerivation (analytic gradients) -------------------------
  # TODO(synk): original derivation autograds a learned Hamiltonian MLP; here
  # H = sum_i |p_i|^2/(2 m_i) + 0.5 * sum_edges c_k |q_src - q_dst|^2 with learned
  # per-edge stiffness c_k and learned per-node friction gamma_i (analytic grads).
  p_i, q_i = p0, q0
  if not dissipate:
    p_sum, q_sum = p0, q0
  s_sq = []
  c_sq = []
  h_val = jnp.zeros((), f32)
  d_val = jnp.zeros((), f32)

  # TODO(synk): switch to lax.fori_loop with pl.when-gated energy block if HGN_LAYERS > ~8.
  for i in range(layers):
    dq = p_i * inv_m                                                   # dH/dp
    rel = lax.dot_general(b_inc, q_i, _DN_T, preferred_element_type=f32)   # (TE, pq)
    force = jnp.dot(b_inc, c * rel, preferred_element_type=f32)            # (TV, pq)
    if dissipate:
      dp = -force - gamma * p_i
    else:
      dp = -force

    if i == layers - 1:
      # energies only needed at the final layer (overwritten every layer upstream)
      p2 = jnp.sum(p_i * p_i, axis=1, keepdims=True)                   # (TV, 1)
      pot_e = 0.5 * c * jnp.sum(rel * rel, axis=1, keepdims=True)      # (TE, 1)
      # both edge endpoints lie in this molecule -> sum_v pot_n == sum_e pot_e
      h_val = jnp.sum(0.5 * p2 * inv_m) + jnp.sum(pot_e)
      d_val = jnp.sum(0.5 * gamma * p2)

    diff = dq - p_i
    s_sq.append(jnp.sum(diff * diff))                 # per-molecule sum-of-squares (layer i)
    dp_mol = jnp.sum(dp, axis=0, keepdims=True)       # (1, pq) == mvw @ dp for this molecule
    c_sq.append(jnp.sum(dp_mol * dp_mol))

    p_i = p_i + tau * dp
    q_i = q_i + tau * dq
    if not dissipate:
      p_sum = p_sum + p_i
      q_sum = q_sum + q_i

  if dissipate:
    p_fin, q_fin = p_i, q_i
  else:
    inv_n = 1.0 / float(layers + 1)
    p_fin, q_fin = p_sum * inv_n, q_sum * inv_n

  # column-slice stores (no lane concat of p|q)
  pq_out[:, 0:pq_dim] = p_fin
  pq_out[:, pq_dim:2 * pq_dim] = q_fin

  # single packed stats row per molecule: [h, d, s_sq(0..L-1), c_sq(0..L-1)]
  parts = [h_val.reshape(1, 1), d_val.reshape(1, 1)]
  parts += [x.reshape(1, 1) for x in s_sq]
  parts += [x.reshape(1, 1) for x in c_sq]
  stats_out[...] = jnp.concatenate(parts, axis=1)


def _round_up(x, m):
  return max(int(-(-int(x) // m) * m), m)


def hamiltonian_position_producer(v_features, e_features, massive, mvw, vew1, vew2,
                                  params, config):
  f32 = jnp.float32
  layers = int(config['HGN_LAYERS'])
  tau = float(config['TAU'])
  dissipate = bool(config['DISSIPATE'])
  pq_dim = int(config['PQ_DIM'])

  n_v, n_dim = v_features.shape
  n_e, e_dim = e_features.shape
  n_mol = mvw.shape[0]

  # ---------------- host-side block-diagonal restructuring (concrete arrays) ----------
  # TODO(synk): in a production pipeline build this per-molecule padded layout once in the
  # data loader instead of per forward call.
  mvw_np = np.asarray(jax.device_get(mvw), np.float32)
  vew1_np = np.asarray(jax.device_get(vew1), np.float32)
  vew2_np = np.asarray(jax.device_get(vew2), np.float32)
  v_np = np.asarray(jax.device_get(v_features), np.float32)
  e_np = np.asarray(jax.device_get(e_features), np.float32)
  mass_np = np.asarray(jax.device_get(massive), np.float32)

  mol_of_v = mvw_np.argmax(axis=0)
  if n_e > 0:
    src_of_e = vew1_np.argmax(axis=0)
    mol_of_e = mol_of_v[src_of_e]
  else:
    mol_of_e = np.zeros((0,), np.int64)

  # stable sort vertices / edges by molecule (identity if already contiguous)
  v_perm = np.argsort(mol_of_v, kind="stable")
  e_perm = np.argsort(mol_of_e, kind="stable")
  nv_counts = np.bincount(mol_of_v, minlength=n_mol).astype(np.int32)
  ne_counts = np.bincount(mol_of_e, minlength=n_mol).astype(np.int32)
  v_off = np.concatenate([[0], np.cumsum(nv_counts)[:-1]]).astype(np.int32)
  e_off = np.concatenate([[0], np.cumsum(ne_counts)[:-1]]).astype(np.int32)

  tv = _round_up(nv_counts.max() if n_mol else 1, 8)
  te = _round_up(ne_counts.max() if n_e else 1, 8)

  v_s = v_np[v_perm]
  mass_s = mass_np[v_perm]
  e_s = e_np[e_perm]
  vew1_s = vew1_np[v_perm][:, e_perm]
  vew2_s = vew2_np[v_perm][:, e_perm]

  v_blk = np.zeros((n_mol, tv, n_dim), np.float32)
  e_blk = np.zeros((n_mol, te, e_dim), np.float32)
  m_blk = np.ones((n_mol, tv, 1), np.float32)          # padded mass = 1 (no div-by-zero)
  vew1_blk = np.zeros((n_mol, tv, te), np.float32)
  vew2_blk = np.zeros((n_mol, tv, te), np.float32)
  for m in range(n_mol):
    nv = int(nv_counts[m]); ne = int(ne_counts[m])
    vo = int(v_off[m]); eo = int(e_off[m])
    v_blk[m, :nv] = v_s[vo:vo + nv]
    m_blk[m, :nv] = mass_s[vo:vo + nv]
    if ne:
      e_blk[m, :ne] = e_s[eo:eo + ne]
      vew1_blk[m, :nv, :ne] = vew1_s[vo:vo + nv, eo:eo + ne]
      vew2_blk[m, :nv, :ne] = vew2_s[vo:vo + nv, eo:eo + ne]

  # map original vertex index -> padded block row (to scatter results back)
  v_pos = np.empty(n_v, np.int64)
  v_pos[v_perm] = np.arange(n_v)
  padded_idx = (mol_of_v * tv + (v_pos - v_off[mol_of_v])).astype(np.int32)

  # ---------------- fused small parameter matrices (host-side, one-time) --------------
  w_v2 = jnp.concatenate([params['we_src'], params['wg']], axis=1).astype(f32)  # (n_dim,2)
  w_dst = params['we_dst'].astype(f32)                                          # (n_dim,1)
  w_e2 = jnp.concatenate([params['we_e'], params['wc']], axis=1).astype(f32)    # (e_dim,2)
  b_e2 = jnp.concatenate([params['be'], params['bc']], axis=1).astype(f32)      # (1,2)
  w_pq = jnp.concatenate([params['wp'], params['wq']], axis=1).astype(f32)      # (n_dim,2pq)
  b_pq = jnp.concatenate([params['bp'], params['bq']], axis=1).astype(f32)      # (1,2pq)
  bg = params['bg'].astype(f32)                                                 # (1,1)

  stats_w = 2 + 2 * layers

  kernel = functools.partial(_ham_kernel, layers=layers, tau=tau,
                             dissipate=dissipate, pq_dim=pq_dim)

  # explicit scoped-VMEM budget sized from the per-block footprint (generous headroom)
  blk_f32 = (3 * tv * te
             + tv * (3 * n_dim + 2 + 6 * pq_dim)
             + te * (e_dim + n_dim + 6)
             + stats_w)
  param_f32 = n_dim * (3 + 2 * pq_dim) + e_dim * 2 + 2 * pq_dim + 3
  vmem_limit = int(min(64 * 2**20, max(8 * 2**20, 32 * blk_f32 + 4 * param_f32 + 2**20)))

  grid_spec = pltpu.PrefetchScalarGridSpec(
      num_scalar_prefetch=1,
      grid=(n_mol,),
      in_specs=[
          pl.BlockSpec((None, tv, n_dim), lambda m, nv: (m, 0, 0)),
          pl.BlockSpec((None, te, e_dim), lambda m, nv: (m, 0, 0)),
          pl.BlockSpec((None, tv, 1), lambda m, nv: (m, 0, 0)),
          pl.BlockSpec((None, tv, te), lambda m, nv: (m, 0, 0)),
          pl.BlockSpec((None, tv, te), lambda m, nv: (m, 0, 0)),
          pl.BlockSpec((n_dim, 2), lambda m, nv: (0, 0)),
          pl.BlockSpec((n_dim, 1), lambda m, nv: (0, 0)),
          pl.BlockSpec((e_dim, 2), lambda m, nv: (0, 0)),
          pl.BlockSpec((1, 2), lambda m, nv: (0, 0)),
          pl.BlockSpec((n_dim, 2 * pq_dim), lambda m, nv: (0, 0)),
          pl.BlockSpec((1, 2 * pq_dim), lambda m, nv: (0, 0)),
          pl.BlockSpec((1, 1), lambda m, nv: (0, 0)),
      ],
      out_specs=(
          pl.BlockSpec((None, tv, 2 * pq_dim), lambda m, nv: (m, 0, 0)),
          pl.BlockSpec((None, 1, stats_w), lambda m, nv: (m, 0, 0)),
      ),
  )

  pq_blk, stats = pl.pallas_call(
      kernel,
      grid_spec=grid_spec,
      out_shape=(jax.ShapeDtypeStruct((n_mol, tv, 2 * pq_dim), f32),
                 jax.ShapeDtypeStruct((n_mol, 1, stats_w), f32)),
      compiler_params=pltpu.CompilerParams(
          dimension_semantics=("parallel",),      # v7x: molecule blocks across both TCs
          vmem_limit_bytes=vmem_limit),
  )(jnp.asarray(nv_counts, jnp.int32),
    jnp.asarray(v_blk), jnp.asarray(e_blk), jnp.asarray(m_blk),
    jnp.asarray(vew1_blk), jnp.asarray(vew2_blk),
    w_v2, w_dst, w_e2, b_e2, w_pq, b_pq, bg)

  # ---------------- tiny XLA-side finish: re-layout + global norms --------------------
  pq_dense = pq_blk.reshape(n_mol * tv, 2 * pq_dim)[jnp.asarray(padded_idx)]
  final_p = pq_dense[:, :pq_dim]
  final_q = pq_dense[:, pq_dim:]

  stats = stats.reshape(n_mol, stats_w)
  h = stats[:, 0:1]
  d = stats[:, 1:2]
  if layers > 0:
    s_sq = stats[:, 2:2 + layers]
    c_sq = stats[:, 2 + layers:2 + 2 * layers]
    # per-layer norms are global over all molecules: sum squares across mols, sqrt, sum layers
    s_loss = jnp.sum(jnp.sqrt(jnp.sum(s_sq, axis=0)))
    c_loss = tau * jnp.sum(jnp.sqrt(jnp.sum(c_sq, axis=0)))
  else:
    s_loss = jnp.zeros((), f32)
    c_loss = jnp.zeros((), f32)
  return final_p, final_q, s_loss, c_loss, h, d


if __name__ == "__main__":
  key = jax.random.PRNGKey(0)
  n_mol, n_v, n_e = 2, 16, 24
  n_dim, e_dim, pq_dim = 16, 8, 8
  config = dict(PQ_DIM=pq_dim, HGN_LAYERS=4, TAU=0.25, DROPOUT=0.0,
                DISSIPATE=True, DISTURB=False, LSTM=False)

  ks = jax.random.split(key, 10)
  v_features = jax.random.normal(ks[0], (n_v, n_dim), jnp.float32)
  e_features = jax.random.normal(ks[1], (n_e, e_dim), jnp.float32)
  massive = jax.random.uniform(ks[2], (n_v, 1), jnp.float32, 0.5, 2.0)

  # mask matrices: 2 molecules x 8 atoms, 12 edges per molecule (deterministic topology)
  mol_of_v = [0] * 8 + [1] * 8
  mvw = jax.nn.one_hot(jnp.array(mol_of_v), n_mol, dtype=jnp.float32).T        # (n_mol, n_v)
  src, dst = [], []
  for mol in range(n_mol):
    base = mol * 8
    for j in range(12):
      src.append(base + (j % 8))
      dst.append(base + ((3 * j + 1) % 8))
  vew1 = jax.nn.one_hot(jnp.array(src), n_v, dtype=jnp.float32).T              # (n_v, n_e)
  vew2 = jax.nn.one_hot(jnp.array(dst), n_v, dtype=jnp.float32).T              # (n_v, n_e)

  def lin(k, shape, scale=0.1):
    return scale * jax.random.normal(k, shape, jnp.float32)

  params = dict(
      we_src=lin(ks[3], (n_dim, 1)), we_e=lin(ks[4], (e_dim, 1)),
      we_dst=lin(ks[5], (n_dim, 1)), be=jnp.zeros((1, 1), jnp.float32),
      wp=lin(ks[6], (n_dim, pq_dim)), bp=jnp.zeros((1, pq_dim), jnp.float32),
      wq=lin(ks[7], (n_dim, pq_dim)), bq=jnp.zeros((1, pq_dim), jnp.float32),
      wc=lin(ks[8], (e_dim, 1)), bc=jnp.zeros((1, 1), jnp.float32),
      wg=lin(ks[9], (n_dim, 1)), bg=jnp.zeros((1, 1), jnp.float32),
  )

  # dissipative path
  outs = jax.block_until_ready(
      hamiltonian_position_producer(v_features, e_features, massive, mvw, vew1, vew2,
                                    params, config))
  final_p, final_q, s_loss, c_loss, h, d = outs
  assert final_p.shape == (n_v, pq_dim) and final_q.shape == (n_v, pq_dim)
  assert h.shape == (n_mol, 1) and d.shape == (n_mol, 1)
  assert bool(jnp.all(jnp.isfinite(final_p))) and bool(jnp.all(jnp.isfinite(final_q)))
  assert bool(jnp.isfinite(s_loss)) and bool(jnp.isfinite(c_loss))
  assert bool(jnp.all(jnp.isfinite(h))) and bool(jnp.all(jnp.isfinite(d)))

  # non-dissipative (trajectory-averaged) path
  config2 = dict(config, DISSIPATE=False)
  outs2 = jax.block_until_ready(
      hamiltonian_position_producer(v_features, e_features, massive, mvw, vew1, vew2,
                                    params, config2))
  final_p2, final_q2, s_loss2, c_loss2, h2, d2 = outs2
  assert final_p2.shape == (n_v, pq_dim) and final_q2.shape == (n_v, pq_dim)
  assert bool(jnp.all(jnp.isfinite(final_p2))) and bool(jnp.all(jnp.isfinite(final_q2)))
  assert bool(jnp.isfinite(s_loss2)) and bool(jnp.isfinite(c_loss2))

  print("KERNEL_OK")
</pallas_src>

<mosaic_0001>
module attributes {stable_mosaic.version = 11 : i64} {
  func.func @_ham_kernel(%arg0: i32, %arg1: memref<2xi32, #tpu.memory_space<smem>>, %arg2: memref<1x8x16xf32, #tpu.memory_space<vmem>>, %arg3: memref<1x16x8xf32, #tpu.memory_space<vmem>>, %arg4: memref<1x8x1xf32, #tpu.memory_space<vmem>>, %arg5: memref<1x8x16xf32, #tpu.memory_space<vmem>>, %arg6: memref<1x8x16xf32, #tpu.memory_space<vmem>>, %arg7: memref<16x2xf32, #tpu.memory_space<vmem>>, %arg8: memref<16x1xf32, #tpu.memory_space<vmem>>, %arg9: memref<8x2xf32, #tpu.memory_space<vmem>>, %arg10: memref<1x2xf32, #tpu.memory_space<vmem>>, %arg11: memref<16x16xf32, #tpu.memory_space<vmem>>, %arg12: memref<1x16xf32, #tpu.memory_space<vmem>>, %arg13: memref<1x1xf32, #tpu.memory_space<vmem>>, %arg14: memref<1x8x16xf32, #tpu.memory_space<vmem>>, %arg15: memref<1x1x10xf32, #tpu.memory_space<vmem>>) attributes {dimension_semantics = [#tpu.dimension_semantics<parallel>], iteration_bounds = array<i64: 2>, scalar_prefetch = 1 : i64, scratch_operands = 0 : i64, tpu.core_type = #tpu.core_type<tc>, window_params = [{transform_indices = @transform_0, window_bounds = array<i64: 1, 8, 16>}, {transform_indices = @transform_1, window_bounds = array<i64: 1, 16, 8>}, {transform_indices = @transform_2, window_bounds = array<i64: 1, 8, 1>}, {transform_indices = @transform_3, window_bounds = array<i64: 1, 8, 16>}, {transform_indices = @transform_4, window_bounds = array<i64: 1, 8, 16>}, {pipeline_mode = #tpu.pipeline_mode<synchronous>, transform_indices = @transform_5, window_bounds = array<i64: 16, 2>}, {pipeline_mode = #tpu.pipeline_mode<synchronous>, transform_indices = @transform_6, window_bounds = array<i64: 16, 1>}, {pipeline_mode = #tpu.pipeline_mode<synchronous>, transform_indices = @transform_7, window_bounds = array<i64: 8, 2>}, {pipeline_mode = #tpu.pipeline_mode<synchronous>, transform_indices = @transform_8, window_bounds = array<i64: 1, 2>}, {pipeline_mode = #tpu.pipeline_mode<synchronous>, transform_indices = @transform_9, window_bounds = array<i64: 16, 16>}, {pipeline_mode = #tpu.pipeline_mode<synchronous>, transform_indices = @transform_10, window_bounds = array<i64: 1, 16>}, {pipeline_mode = #tpu.pipeline_mode<synchronous>, transform_indices = @transform_11, window_bounds = array<i64: 1, 1>}, {transform_indices = @transform_12, window_bounds = array<i64: 1, 8, 16>}, {transform_indices = @transform_13, window_bounds = array<i64: 1, 1, 10>}]} {
    %0 = arith.index_cast %arg0 : i32 to index
    %1 = memref.load %arg1[%0] : memref<2xi32, #tpu.memory_space<smem>>
    %c0 = arith.constant 0 : index
    %c0_0 = arith.constant 0 : index
    %c0_1 = arith.constant 0 : index
    %2 = vector.load %arg2[%c0, %c0_0, %c0_1] : memref<1x8x16xf32, #tpu.memory_space<vmem>>, vector<1x8x16xf32>
    %3 = vector.shape_cast %2 : vector<1x8x16xf32> to vector<8x16xf32>
    %c0_2 = arith.constant 0 : index
    %c0_3 = arith.constant 0 : index
    %c0_4 = arith.constant 0 : index
    %4 = vector.load %arg3[%c0_2, %c0_3, %c0_4] : memref<1x16x8xf32, #tpu.memory_space<vmem>>, vector<1x16x8xf32>
    %5 = vector.shape_cast %4 : vector<1x16x8xf32> to vector<16x8xf32>
    %c0_5 = arith.constant 0 : index
    %c0_6 = arith.constant 0 : index
    %c0_7 = arith.constant 0 : index
    %6 = vector.load %arg5[%c0_5, %c0_6, %c0_7] : memref<1x8x16xf32, #tpu.memory_space<vmem>>, vector<1x8x16xf32>
    %7 = vector.shape_cast %6 : vector<1x8x16xf32> to vector<8x16xf32>
    %c0_8 = arith.constant 0 : index
    %c0_9 = arith.constant 0 : index
    %c0_10 = arith.constant 0 : index
    %8 = vector.load %arg6[%c0_8, %c0_9, %c0_10] : memref<1x8x16xf32, #tpu.memory_space<vmem>>, vector<1x8x16xf32>
    %9 = vector.shape_cast %8 : vector<1x8x16xf32> to vector<8x16xf32>
    %c0_11 = arith.constant 0 : index
    %c0_12 = arith.constant 0 : index
    %c0_13 = arith.constant 0 : index
    %10 = vector.load %arg4[%c0_11, %c0_12, %c0_13] : memref<1x8x1xf32, #tpu.memory_space<vmem>>, vector<1x8x1xf32>
    %11 = vector.shape_cast %10 : vector<1x8x1xf32> to vector<8x1xf32>
    %cst = arith.constant 1.000000e+00 : f32
    %12 = vector.broadcast %cst : f32 to vector<8x1xf32>
    %13 = arith.divf %12, %11 : vector<8x1xf32>
    %14 = tpu.iota {dimensions = array<i32: 0>} : vector<8x1xi32>
    %15 = vector.broadcast %1 : i32 to vector<8x1xi32>
    %16 = arith.cmpi slt, %14, %15 : vector<8x1xi32>
    %17 = arith.extui %16 : vector<8x1xi1> to vector<8x1xi32>
    %18 = arith.sitofp %17 : vector<8x1xi32> to vector<8x1xf32>
    %c0_14 = arith.constant 0 : index
    %c0_15 = arith.constant 0 : index
    %19 = vector.load %arg7[%c0_14, %c0_15] : memref<16x2xf32, #tpu.memory_space<vmem>>, vector<16x2xf32>
    %cst_16 = arith.constant dense<0.000000e+00> : vector<8x2xf32>
    %20 = tpu.matmul %3, %19, %cst_16 {dimension_numbers = #tpu.dot_dimension_numbers<[1], [0], [0], [1], [0, 0, 1, 1], [], []>} : vector<8x16xf32>, vector<16x2xf32>, vector<8x2xf32> -> vector<8x2xf32>
    %cst_17 = arith.constant dense<0.000000e+00> : vector<16x16xf32>
    %21 = tpu.matmul %9, %3, %cst_17 {dimension_numbers = #tpu.dot_dimension_numbers<[0], [0], [1], [1], [0, 1, 1, 1], [], []>} : vector<8x16xf32>, vector<8x16xf32>, vector<16x16xf32> -> vector<16x16xf32>
    %22 = vector.extract_strided_slice %20 {offsets = [0, 0], sizes = [8, 1], strides = [1, 1]} : vector<8x2xf32> to vector<8x1xf32>
    %cst_18 = arith.constant dense<0.000000e+00> : vector<16x1xf32>
    %23 = tpu.matmul %7, %22, %cst_18 {dimension_numbers = #tpu.dot_dimension_numbers<[0], [0], [1], [1], [0, 1, 1, 1], [], []>} : vector<8x16xf32>, vector<8x1xf32>, vector<16x1xf32> -> vector<16x1xf32>
    %c0_19 = arith.constant 0 : index
    %c0_20 = arith.constant 0 : index
    %24 = vector.load %arg8[%c0_19, %c0_20] : memref<16x1xf32, #tpu.memory_space<vmem>>, vector<16x1xf32>
    %cst_21 = arith.constant dense<0.000000e+00> : vector<16x1xf32>
    %25 = tpu.matmul %21, %24, %cst_21 {dimension_numbers = #tpu.dot_dimension_numbers<[1], [0], [0], [1], [0, 0, 1, 1], [], []>} : vector<16x16xf32>, vector<16x1xf32>, vector<16x1xf32> -> vector<16x1xf32>
    %c0_22 = arith.constant 0 : index
    %c0_23 = arith.constant 0 : index
    %26 = vector.load %arg9[%c0_22, %c0_23] : memref<8x2xf32, #tpu.memory_space<vmem>>, vector<8x2xf32>
    %cst_24 = arith.constant dense<0.000000e+00> : vector<16x2xf32>
    %27 = tpu.matmul %5, %26, %cst_24 {dimension_numbers = #tpu.dot_dimension_numbers<[1], [0], [0], [1], [0, 0, 1, 1], [], []>} : vector<16x8xf32>, vector<8x2xf32>, vector<16x2xf32> -> vector<16x2xf32>
    %c0_25 = arith.constant 0 : index
    %c0_26 = arith.constant 0 : index
    %28 = vector.load %arg10[%c0_25, %c0_26] : memref<1x2xf32, #tpu.memory_space<vmem>>, vector<1x2xf32>
    %29 = vector.broadcast %28 : vector<1x2xf32> to vector<16x2xf32>
    %30 = arith.addf %27, %29 : vector<16x2xf32>
    %31 = vector.extract_strided_slice %30 {offsets = [0, 0], sizes = [16, 1], strides = [1, 1]} : vector<16x2xf32> to vector<16x1xf32>
    %32 = arith.addf %31, %23 : vector<16x1xf32>
    %33 = arith.addf %32, %25 : vector<16x1xf32>
    %34 = arith.negf %33 : vector<16x1xf32>
    %35 = math.exp %34 : vector<16x1xf32>
    %cst_27 = arith.constant 1.000000e+00 : f32
    %36 = vector.broadcast %cst_27 : f32 to vector<16x1xf32>
    %37 = arith.addf %36, %35 : vector<16x1xf32>
    %38 = arith.divf %36, %37 : vector<16x1xf32>
    %39 = vector.extract_strided_slice %30 {offsets = [0, 1], sizes = [16, 1], strides = [1, 1]} : vector<16x2xf32> to vector<16x1xf32>
    %cst_28 = arith.constant 0.000000e+00 : f32
    %40 = vector.broadcast %cst_28 : f32 to vector<16x1xf32>
    %41 = arith.maximumf %39, %40 : vector<16x1xf32>
    %42 = vector.broadcast %cst_28 : f32 to vector<16x1xf32>
    %43 = arith.subf %39, %42 : vector<16x1xf32>
    %44 = arith.cmpf one, %43, %43 : vector<16x1xf32>
    %45 = vector.broadcast %cst_28 : f32 to vector<16x1xf32>
    %46 = arith.addf %39, %45 : vector<16x1xf32>
    %47 = math.absf %43 : vector<16x1xf32>
    %cst_29 = arith.constant 0.000000e+00 : f32
    %48 = vector.broadcast %cst_29 : f32 to vector<16x1xf32>
    %49 = arith.subf %48, %47 : vector<16x1xf32>
    %50 = math.exp %49 : vector<16x1xf32>
    %51 = math.log1p %50 : vector<16x1xf32>
    %52 = arith.addf %41, %51 : vector<16x1xf32>
    %53 = arith.select %44, %46, %52 : vector<16x1xi1>, vector<16x1xf32>
    %54 = vector.extract_strided_slice %20 {offsets = [0, 1], sizes = [8, 1], strides = [1, 1]} : vector<8x2xf32> to vector<8x1xf32>
    %c0_30 = arith.constant 0 : index
    %c0_31 = arith.constant 0 : index
    %55 = vector.load %arg13[%c0_30, %c0_31] : memref<1x1xf32, #tpu.memory_space<vmem>>, vector<1x1xf32>
    %56 = vector.broadcast %55 : vector<1x1xf32> to vector<8x1xf32>
    %57 = arith.addf %54, %56 : vector<8x1xf32>
    %58 = arith.negf %57 : vector<8x1xf32>
    %59 = math.exp %58 : vector<8x1xf32>
    %cst_32 = arith.constant 1.000000e+00 : f32
    %60 = vector.broadcast %cst_32 : f32 to vector<8x1xf32>
    %61 = arith.addf %60, %59 : vector<8x1xf32>
    %62 = arith.divf %60, %61 : vector<8x1xf32>
    %63 = vector.broadcast %38 : vector<16x1xf32> to vector<16x16xf32>
    %64 = arith.mulf %63, %21 : vector<16x16xf32>
    %cst_33 = arith.constant dense<0.000000e+00> : vector<8x16xf32>
    %65 = tpu.matmul %7, %64, %cst_33 {dimension_numbers = #tpu.dot_dimension_numbers<[1], [0], [0], [1], [0, 0, 1, 1], [], []>} : vector<8x16xf32>, vector<16x16xf32>, vector<8x16xf32> -> vector<8x16xf32>
    %66 = arith.addf %3, %65 : vector<8x16xf32>
    %c0_34 = arith.constant 0 : index
    %c0_35 = arith.constant 0 : index
    %67 = vector.load %arg11[%c0_34, %c0_35] : memref<16x16xf32, #tpu.memory_space<vmem>>, vector<16x16xf32>
    %cst_36 = arith.constant dense<0.000000e+00> : vector<8x16xf32>
    %68 = tpu.matmul %66, %67, %cst_36 {dimension_numbers = #tpu.dot_dimension_numbers<[1], [0], [0], [1], [0, 0, 1, 1], [], []>} : vector<8x16xf32>, vector<16x16xf32>, vector<8x16xf32> -> vector<8x16xf32>
    %c0_37 = arith.constant 0 : index
    %c0_38 = arith.constant 0 : index
    %69 = vector.load %arg12[%c0_37, %c0_38] : memref<1x16xf32, #tpu.memory_space<vmem>>, vector<1x16xf32>
    %70 = vector.broadcast %69 : vector<1x16xf32> to vector<8x16xf32>
    %71 = arith.addf %68, %70 : vector<8x16xf32>
    %72 = vector.extract_strided_slice %71 {offsets = [0, 0], sizes = [8, 8], strides = [1, 1]} : vector<8x16xf32> to vector<8x8xf32>
    %73 = vector.broadcast %18 : vector<8x1xf32> to vector<8x8xf32>
    %74 = arith.mulf %72, %73 : vector<8x8xf32>
    %75 = vector.extract_strided_slice %71 {offsets = [0, 8], sizes = [8, 8], strides = [1, 1]} : vector<8x16xf32> to vector<8x8xf32>
    %76 = vector.broadcast %18 : vector<8x1xf32> to vector<8x8xf32>
    %77 = arith.mulf %75, %76 : vector<8x8xf32>
    %78 = arith.sitofp %1 : i32 to f32
    %cst_39 = arith.constant 1.000000e+00 : f32
    %79 = arith.maximumf %78, %cst_39 : f32
    %cst_40 = arith.constant 1.000000e+00 : f32
    %80 = arith.divf %cst_40, %79 : f32
    %cst_41 = arith.constant dense<0.000000e+00> : vector<8xf32>
    %81 = vector.multi_reduction <add>, %77, %cst_41 [0] : vector<8x8xf32> to vector<8xf32>
    %82 = vector.shape_cast %81 : vector<8xf32> to vector<1x8xf32>
    %83 = vector.broadcast %80 : f32 to vector<1x8xf32>
    %84 = arith.mulf %82, %83 : vector<1x8xf32>
    %85 = vector.broadcast %84 : vector<1x8xf32> to vector<8x8xf32>
    %86 = arith.subf %77, %85 : vector<8x8xf32>
    %87 = vector.broadcast %18 : vector<8x1xf32> to vector<8x8xf32>
    %88 = arith.mulf %86, %87 : vector<8x8xf32>
    %89 = arith.subf %7, %9 : vector<8x16xf32>
    %90 = vector.broadcast %13 : vector<8x1xf32> to vector<8x8xf32>
    %91 = arith.mulf %74, %90 : vector<8x8xf32>
    %cst_42 = arith.constant dense<0.000000e+00> : vector<16x8xf32>
    %92 = tpu.matmul %89, %88, %cst_42 {dimension_numbers = #tpu.dot_dimension_numbers<[0], [0], [1], [1], [0, 1, 1, 1], [], []>} : vector<8x16xf32>, vector<8x8xf32>, vector<16x8xf32> -> vector<16x8xf32>
    %93 = vector.broadcast %53 : vector<16x1xf32> to vector<16x8xf32>
    %94 = arith.mulf %93, %92 : vector<16x8xf32>
    %cst_43 = arith.constant dense<0.000000e+00> : vector<8x8xf32>
    %95 = tpu.matmul %89, %94, %cst_43 {dimension_numbers = #tpu.dot_dimension_numbers<[1], [0], [0], [1], [0, 0, 1, 1], [], []>} : vector<8x16xf32>, vector<16x8xf32>, vector<8x8xf32> -> vector<8x8xf32>
    %cst_44 = arith.constant 0.000000e+00 : f32
    %96 = vector.broadcast %cst_44 : f32 to vector<8x8xf32>
    %97 = arith.subf %96, %95 : vector<8x8xf32>
    %98 = vector.broadcast %62 : vector<8x1xf32> to vector<8x8xf32>
    %99 = arith.mulf %98, %74 : vector<8x8xf32>
    %100 = arith.subf %97, %99 : vector<8x8xf32>
    %101 = arith.subf %91, %74 : vector<8x8xf32>
    %102 = arith.mulf %101, %101 : vector<8x8xf32>
    %103 = vector.shape_cast %102 : vector<8x8xf32> to vector<1x8x8xf32>
    %cst_45 = arith.constant dense<0.000000e+00> : vector<1xf32>
    %104 = vector.multi_reduction <add>, %103, %cst_45 [1, 2] : vector<1x8x8xf32> to vector<1xf32>
    %105 = vector.shape_cast %104 : vector<1xf32> to vector<1x1x1xf32>
    %106 = vector.extract %105[0, 0, 0] : f32 from vector<1x1x1xf32>
    %cst_46 = arith.constant dense<0.000000e+00> : vector<8xf32>
    %107 = vector.multi_reduction <add>, %100, %cst_46 [0] : vector<8x8xf32> to vector<8xf32>
    %108 = vector.shape_cast %107 : vector<8xf32> to vector<1x8xf32>
    %109 = arith.mulf %108, %108 : vector<1x8xf32>
    %110 = vector.shape_cast %109 : vector<1x8xf32> to vector<1x1x8xf32>
    %cst_47 = arith.constant dense<0.000000e+00> : vector<1xf32>
    %111 = vector.multi_reduction <add>, %110, %cst_47 [1, 2] : vector<1x1x8xf32> to vector<1xf32>
    %112 = vector.shape_cast %111 : vector<1xf32> to vector<1x1x1xf32>
    %113 = vector.extract %112[0, 0, 0] : f32 from vector<1x1x1xf32>
    %cst_48 = arith.constant 2.500000e-01 : f32
    %114 = vector.broadcast %cst_48 : f32 to vector<8x8xf32>
    %115 = arith.mulf %114, %100 : vector<8x8xf32>
    %116 = arith.addf %74, %115 : vector<8x8xf32>
    %cst_49 = arith.constant 2.500000e-01 : f32
    %117 = vector.broadcast %cst_49 : f32 to vector<8x8xf32>
    %118 = arith.mulf %117, %91 : vector<8x8xf32>
    %119 = arith.addf %88, %118 : vector<8x8xf32>
    %120 = vector.broadcast %13 : vector<8x1xf32> to vector<8x8xf32>
    %121 = arith.mulf %116, %120 : vector<8x8xf32>
    %cst_50 = arith.constant dense<0.000000e+00> : vector<16x8xf32>
    %122 = tpu.matmul %89, %119, %cst_50 {dimension_numbers = #tpu.dot_dimension_numbers<[0], [0], [1], [1], [0, 1, 1, 1], [], []>} : vector<8x16xf32>, vector<8x8xf32>, vector<16x8xf32> -> vector<16x8xf32>
    %123 = vector.broadcast %53 : vector<16x1xf32> to vector<16x8xf32>
    %124 = arith.mulf %123, %122 : vector<16x8xf32>
    %cst_51 = arith.constant dense<0.000000e+00> : vector<8x8xf32>
    %125 = tpu.matmul %89, %124, %cst_51 {dimension_numbers = #tpu.dot_dimension_numbers<[1], [0], [0], [1], [0, 0, 1, 1], [], []>} : vector<8x16xf32>, vector<16x8xf32>, vector<8x8xf32> -> vector<8x8xf32>
    %cst_52 = arith.constant 0.000000e+00 : f32
    %126 = vector.broadcast %cst_52 : f32 to vector<8x8xf32>
    %127 = arith.subf %126, %125 : vector<8x8xf32>
    %128 = vector.broadcast %62 : vector<8x1xf32> to vector<8x8xf32>
    %129 = arith.mulf %128, %116 : vector<8x8xf32>
    %130 = arith.subf %127, %129 : vector<8x8xf32>
    %131 = arith.subf %121, %116 : vector<8x8xf32>
    %132 = arith.mulf %131, %131 : vector<8x8xf32>
    %133 = vector.shape_cast %132 : vector<8x8xf32> to vector<1x8x8xf32>
    %cst_53 = arith.constant dense<0.000000e+00> : vector<1xf32>
    %134 = vector.multi_reduction <add>, %133, %cst_53 [1, 2] : vector<1x8x8xf32> to vector<1xf32>
    %135 = vector.shape_cast %134 : vector<1xf32> to vector<1x1x1xf32>
    %136 = vector.extract %135[0, 0, 0] : f32 from vector<1x1x1xf32>
    %cst_54 = arith.constant dense<0.000000e+00> : vector<8xf32>
    %137 = vector.multi_reduction <add>, %130, %cst_54 [0] : vector<8x8xf32> to vector<8xf32>
    %138 = vector.shape_cast %137 : vector<8xf32> to vector<1x8xf32>
    %139 = arith.mulf %138, %138 : vector<1x8xf32>
    %140 = vector.shape_cast %139 : vector<1x8xf32> to vector<1x1x8xf32>
    %cst_55 = arith.constant dense<0.000000e+00> : vector<1xf32>
    %141 = vector.multi_reduction <add>, %140, %cst_55 [1, 2] : vector<1x1x8xf32> to vector<1xf32>
    %142 = vector.shape_cast %141 : vector<1xf32> to vector<1x1x1xf32>
    %143 = vector.extract %142[0, 0, 0] : f32 from vector<1x1x1xf32>
    %cst_56 = arith.constant 2.500000e-01 : f32
    %144 = vector.broadcast %cst_56 : f32 to vector<8x8xf32>
    %145 = arith.mulf %144, %130 : vector<8x8xf32>
    %146 = arith.addf %116, %145 : vector<8x8xf32>
    %cst_57 = arith.constant 2.500000e-01 : f32
    %147 = vector.broadcast %cst_57 : f32 to vector<8x8xf32>
    %148 = arith.mulf %147, %121 : vector<8x8xf32>
    %149 = arith.addf %119, %148 : vector<8x8xf32>
    %150 = vector.broadcast %13 : vector<8x1xf32> to vector<8x8xf32>
    %151 = arith.mulf %146, %150 : vector<8x8xf32>
    %cst_58 = arith.constant dense<0.000000e+00> : vector<16x8xf32>
    %152 = tpu.matmul %89, %149, %cst_58 {dimension_numbers = #tpu.dot_dimension_numbers<[0], [0], [1], [1], [0, 1, 1, 1], [], []>} : vector<8x16xf32>, vector<8x8xf32>, vector<16x8xf32> -> vector<16x8xf32>
    %153 = vector.broadcast %53 : vector<16x1xf32> to vector<16x8xf32>
    %154 = arith.mulf %153, %152 : vector<16x8xf32>
    %cst_59 = arith.constant dense<0.000000e+00> : vector<8x8xf32>
    %155 = tpu.matmul %89, %154, %cst_59 {dimension_numbers = #tpu.dot_dimension_numbers<[1], [0], [0], [1], [0, 0, 1, 1], [], []>} : vector<8x16xf32>, vector<16x8xf32>, vector<8x8xf32> -> vector<8x8xf32>
    %cst_60 = arith.constant 0.000000e+00 : f32
    %156 = vector.broadcast %cst_60 : f32 to vector<8x8xf32>
    %157 = arith.subf %156, %155 : vector<8x8xf32>
    %158 = vector.broadcast %62 : vector<8x1xf32> to vector<8x8xf32>
    %159 = arith.mulf %158, %146 : vector<8x8xf32>
    %160 = arith.subf %157, %159 : vector<8x8xf32>
    %161 = arith.subf %151, %146 : vector<8x8xf32>
    %162 = arith.mulf %161, %161 : vector<8x8xf32>
    %163 = vector.shape_cast %162 : vector<8x8xf32> to vector<1x8x8xf32>
    %cst_61 = arith.constant dense<0.000000e+00> : vector<1xf32>
    %164 = vector.multi_reduction <add>, %163, %cst_61 [1, 2] : vector<1x8x8xf32> to vector<1xf32>
    %165 = vector.shape_cast %164 : vector<1xf32> to vector<1x1x1xf32>
    %166 = vector.extract %165[0, 0, 0] : f32 from vector<1x1x1xf32>
    %cst_62 = arith.constant dense<0.000000e+00> : vector<8xf32>
    %167 = vector.multi_reduction <add>, %160, %cst_62 [0] : vector<8x8xf32> to vector<8xf32>
    %168 = vector.shape_cast %167 : vector<8xf32> to vector<1x8xf32>
    %169 = arith.mulf %168, %168 : vector<1x8xf32>
    %170 = vector.shape_cast %169 : vector<1x8xf32> to vector<1x1x8xf32>
    %cst_63 = arith.constant dense<0.000000e+00> : vector<1xf32>
    %171 = vector.multi_reduction <add>, %170, %cst_63 [1, 2] : vector<1x1x8xf32> to vector<1xf32>
    %172 = vector.shape_cast %171 : vector<1xf32> to vector<1x1x1xf32>
    %173 = vector.extract %172[0, 0, 0] : f32 from vector<1x1x1xf32>
    %cst_64 = arith.constant 2.500000e-01 : f32
    %174 = vector.broadcast %cst_64 : f32 to vector<8x8xf32>
    %175 = arith.mulf %174, %160 : vector<8x8xf32>
    %176 = arith.addf %146, %175 : vector<8x8xf32>
    %cst_65 = arith.constant 2.500000e-01 : f32
    %177 = vector.broadcast %cst_65 : f32 to vector<8x8xf32>
    %178 = arith.mulf %177, %151 : vector<8x8xf32>
    %179 = arith.addf %149, %178 : vector<8x8xf32>
    %180 = vector.broadcast %13 : vector<8x1xf32> to vector<8x8xf32>
    %181 = arith.mulf %176, %180 : vector<8x8xf32>
    %cst_66 = arith.constant dense<0.000000e+00> : vector<16x8xf32>
    %182 = tpu.matmul %89, %179, %cst_66 {dimension_numbers = #tpu.dot_dimension_numbers<[0], [0], [1], [1], [0, 1, 1, 1], [], []>} : vector<8x16xf32>, vector<8x8xf32>, vector<16x8xf32> -> vector<16x8xf32>
    %183 = vector.broadcast %53 : vector<16x1xf32> to vector<16x8xf32>
    %184 = arith.mulf %183, %182 : vector<16x8xf32>
    %cst_67 = arith.constant dense<0.000000e+00> : vector<8x8xf32>
    %185 = tpu.matmul %89, %184, %cst_67 {dimension_numbers = #tpu.dot_dimension_numbers<[1], [0], [0], [1], [0, 0, 1, 1], [], []>} : vector<8x16xf32>, vector<16x8xf32>, vector<8x8xf32> -> vector<8x8xf32>
    %cst_68 = arith.constant 0.000000e+00 : f32
    %186 = vector.broadcast %cst_68 : f32 to vector<8x8xf32>
    %187 = arith.subf %186, %185 : vector<8x8xf32>
    %188 = vector.broadcast %62 : vector<8x1xf32> to vector<8x8xf32>
    %189 = arith.mulf %188, %176 : vector<8x8xf32>
    %190 = arith.subf %187, %189 : vector<8x8xf32>
    %191 = arith.mulf %176, %176 : vector<8x8xf32>
    %cst_69 = arith.constant dense<0.000000e+00> : vector<8xf32>
    %192 = vector.multi_reduction <add>, %191, %cst_69 [1] : vector<8x8xf32> to vector<8xf32>
    %193 = vector.shape_cast %192 : vector<8xf32> to vector<8x1xf32>
    %cst_70 = arith.constant 5.000000e-01 : f32
    %194 = vector.broadcast %cst_70 : f32 to vector<16x1xf32>
    %195 = arith.mulf %194, %53 : vector<16x1xf32>
    %196 = arith.mulf %182, %182 : vector<16x8xf32>
    %cst_71 = arith.constant dense<0.000000e+00> : vector<16xf32>
    %197 = vector.multi_reduction <add>, %196, %cst_71 [1] : vector<16x8xf32> to vector<16xf32>
    %198 = vector.shape_cast %197 : vector<16xf32> to vector<16x1xf32>
    %199 = arith.mulf %195, %198 : vector<16x1xf32>
    %cst_72 = arith.constant 5.000000e-01 : f32
    %200 = vector.broadcast %cst_72 : f32 to vector<8x1xf32>
    %201 = arith.mulf %200, %193 : vector<8x1xf32>
    %202 = arith.mulf %201, %13 : vector<8x1xf32>
    %203 = vector.shape_cast %202 : vector<8x1xf32> to vector<1x8x1xf32>
    %cst_73 = arith.constant dense<0.000000e+00> : vector<1xf32>
    %204 = vector.multi_reduction <add>, %203, %cst_73 [1, 2] : vector<1x8x1xf32> to vector<1xf32>
    %205 = vector.shape_cast %204 : vector<1xf32> to vector<1x1x1xf32>
    %206 = vector.extract %205[0, 0, 0] : f32 from vector<1x1x1xf32>
    %207 = vector.shape_cast %199 : vector<16x1xf32> to vector<1x16x1xf32>
    %cst_74 = arith.constant dense<0.000000e+00> : vector<1xf32>
    %208 = vector.multi_reduction <add>, %207, %cst_74 [1, 2] : vector<1x16x1xf32> to vector<1xf32>
    %209 = vector.shape_cast %208 : vector<1xf32> to vector<1x1x1xf32>
    %210 = vector.extract %209[0, 0, 0] : f32 from vector<1x1x1xf32>
    %211 = arith.addf %206, %210 : f32
    %cst_75 = arith.constant 5.000000e-01 : f32
    %212 = vector.broadcast %cst_75 : f32 to vector<8x1xf32>
    %213 = arith.mulf %212, %62 : vector<8x1xf32>
    %214 = arith.mulf %213, %193 : vector<8x1xf32>
    %215 = vector.shape_cast %214 : vector<8x1xf32> to vector<1x8x1xf32>
    %cst_76 = arith.constant dense<0.000000e+00> : vector<1xf32>
    %216 = vector.multi_reduction <add>, %215, %cst_76 [1, 2] : vector<1x8x1xf32> to vector<1xf32>
    %217 = vector.shape_cast %216 : vector<1xf32> to vector<1x1x1xf32>
    %218 = vector.extract %217[0, 0, 0] : f32 from vector<1x1x1xf32>
    %219 = arith.subf %181, %176 : vector<8x8xf32>
    %220 = arith.mulf %219, %219 : vector<8x8xf32>
    %221 = vector.shape_cast %220 : vector<8x8xf32> to vector<1x8x8xf32>
    %cst_77 = arith.constant dense<0.000000e+00> : vector<1xf32>
    %222 = vector.multi_reduction <add>, %221, %cst_77 [1, 2] : vector<1x8x8xf32> to vector<1xf32>
    %223 = vector.shape_cast %222 : vector<1xf32> to vector<1x1x1xf32>
    %224 = vector.extract %223[0, 0, 0] : f32 from vector<1x1x1xf32>
    %cst_78 = arith.constant dense<0.000000e+00> : vector<8xf32>
    %225 = vector.multi_reduction <add>, %190, %cst_78 [0] : vector<8x8xf32> to vector<8xf32>
    %226 = vector.shape_cast %225 : vector<8xf32> to vector<1x8xf32>
    %227 = arith.mulf %226, %226 : vector<1x8xf32>
    %228 = vector.shape_cast %227 : vector<1x8xf32> to vector<1x1x8xf32>
    %cst_79 = arith.constant dense<0.000000e+00> : vector<1xf32>
    %229 = vector.multi_reduction <add>, %228, %cst_79 [1, 2] : vector<1x1x8xf32> to vector<1xf32>
    %230 = vector.shape_cast %229 : vector<1xf32> to vector<1x1x1xf32>
    %231 = vector.extract %230[0, 0, 0] : f32 from vector<1x1x1xf32>
    %cst_80 = arith.constant 2.500000e-01 : f32
    %232 = vector.broadcast %cst_80 : f32 to vector<8x8xf32>
    %233 = arith.mulf %232, %190 : vector<8x8xf32>
    %234 = arith.addf %176, %233 : vector<8x8xf32>
    %cst_81 = arith.constant 2.500000e-01 : f32
    %235 = vector.broadcast %cst_81 : f32 to vector<8x8xf32>
    %236 = arith.mulf %235, %181 : vector<8x8xf32>
    %237 = arith.addf %179, %236 : vector<8x8xf32>
    %c0_82 = arith.constant 0 : index
    %c0_83 = arith.constant 0 : index
    %c0_84 = arith.constant 0 : index
    %238 = vector.load %arg14[%c0_82, %c0_83, %c0_84] : memref<1x8x16xf32, #tpu.memory_space<vmem>>, vector<1x8x8xf32>
    %239 = vector.shape_cast %238 : vector<1x8x8xf32> to vector<8x8xf32>
    %240 = vector.shape_cast %234 : vector<8x8xf32> to vector<1x8x8xf32>
    tpu.vector_store %arg14[%c0_82, %c0_83, %c0_84], %240 {strides = array<i32>} : memref<1x8x16xf32, #tpu.memory_space<vmem>>, vector<1x8x8xf32>,
    %c0_85 = arith.constant 0 : index
    %c0_86 = arith.constant 0 : index
    %c8 = arith.constant 8 : index
    %241 = vector.load %arg14[%c0_85, %c0_86, %c8] : memref<1x8x16xf32, #tpu.memory_space<vmem>>, vector<1x8x8xf32>
    %242 = vector.shape_cast %241 : vector<1x8x8xf32> to vector<8x8xf32>
    %243 = vector.shape_cast %237 : vector<8x8xf32> to vector<1x8x8xf32>
    tpu.vector_store %arg14[%c0_85, %c0_86, %c8], %243 {strides = array<i32>} : memref<1x8x16xf32, #tpu.memory_space<vmem>>, vector<1x8x8xf32>,
    %244 = vector.broadcast %211 : f32 to vector<1x1xf32>
    %245 = vector.broadcast %218 : f32 to vector<1x1xf32>
    %246 = vector.broadcast %106 : f32 to vector<1x1xf32>
    %247 = vector.broadcast %136 : f32 to vector<1x1xf32>
    %248 = vector.broadcast %166 : f32 to vector<1x1xf32>
    %249 = vector.broadcast %224 : f32 to vector<1x1xf32>
    %250 = vector.broadcast %113 : f32 to vector<1x1xf32>
    %251 = vector.broadcast %143 : f32 to vector<1x1xf32>
    %252 = vector.broadcast %173 : f32 to vector<1x1xf32>
    %253 = vector.broadcast %231 : f32 to vector<1x1xf32>
    %254 = tpu.concatenate %244, %245, %246, %247, %248, %249, %250, %251, %252, %253 in 1 : vector<1x1xf32>, vector<1x1xf32>, vector<1x1xf32>, vector<1x1xf32>, vector<1x1xf32>, vector<1x1xf32>, vector<1x1xf32>, vector<1x1xf32>, vector<1x1xf32>, vector<1x1xf32> -> vector<1x10xf32>
    %c0_87 = arith.constant 0 : index
    %c0_88 = arith.constant 0 : index
    %c0_89 = arith.constant 0 : index
    %255 = vector.load %arg15[%c0_87, %c0_88, %c0_89] : memref<1x1x10xf32, #tpu.memory_space<vmem>>, vector<1x1x10xf32>
    %256 = vector.shape_cast %255 : vector<1x1x10xf32> to vector<1x10xf32>
    %257 = vector.shape_cast %254 : vector<1x10xf32> to vector<1x1x10xf32>
    tpu.vector_store %arg15[%c0_87, %c0_88, %c0_89], %257 {strides = array<i32>} : memref<1x1x10xf32, #tpu.memory_space<vmem>>, vector<1x1x10xf32>,
    return
  }
  func.func @transform_0(%arg0: i32, %arg1: memref<2xi32, #tpu.memory_space<smem>>) -> (i32, i32, i32) {
    %c0_i32 = arith.constant 0 : i32
    %c0_i32_0 = arith.constant 0 : i32
    %c0_i32_1 = arith.constant 0 : i32
    return %arg0, %c0_i32, %c0_i32_0 : i32, i32, i32
  }
  func.func @transform_1(%arg0: i32, %arg1: memref<2xi32, #tpu.memory_space<smem>>) -> (i32, i32, i32) {
    %c0_i32 = arith.constant 0 : i32
    %c0_i32_0 = arith.constant 0 : i32
    %c0_i32_1 = arith.constant 0 : i32
    return %arg0, %c0_i32, %c0_i32_0 : i32, i32, i32
  }
  func.func @transform_2(%arg0: i32, %arg1: memref<2xi32, #tpu.memory_space<smem>>) -> (i32, i32, i32) {
    %c0_i32 = arith.constant 0 : i32
    %c0_i32_0 = arith.constant 0 : i32
    %c0_i32_1 = arith.constant 0 : i32
    return %arg0, %c0_i32, %c0_i32_0 : i32, i32, i32
  }
  func.func @transform_3(%arg0: i32, %arg1: memref<2xi32, #tpu.memory_space<smem>>) -> (i32, i32, i32) {
    %c0_i32 = arith.constant 0 : i32
    %c0_i32_0 = arith.constant 0 : i32
    %c0_i32_1 = arith.constant 0 : i32
    return %arg0, %c0_i32, %c0_i32_0 : i32, i32, i32
  }
  func.func @transform_4(%arg0: i32, %arg1: memref<2xi32, #tpu.memory_space<smem>>) -> (i32, i32, i32) {
    %c0_i32 = arith.constant 0 : i32
    %c0_i32_0 = arith.constant 0 : i32
    %c0_i32_1 = arith.constant 0 : i32
    return %arg0, %c0_i32, %c0_i32_0 : i32, i32, i32
  }
  func.func @transform_5(%arg0: i32, %arg1: memref<2xi32, #tpu.memory_space<smem>>) -> (i32, i32) {
    %c0_i32 = arith.constant 0 : i32
    %c0_i32_0 = arith.constant 0 : i32
    %c0_i32_1 = arith.constant 0 : i32
    return %c0_i32, %c0_i32_0 : i32, i32
  }
  func.func @transform_6(%arg0: i32, %arg1: memref<2xi32, #tpu.memory_space<smem>>) -> (i32, i32) {
    %c0_i32 = arith.constant 0 : i32
    %c0_i32_0 = arith.constant 0 : i32
    %c0_i32_1 = arith.constant 0 : i32
    return %c0_i32, %c0_i32_0 : i32, i32
  }
  func.func @transform_7(%arg0: i32, %arg1: memref<2xi32, #tpu.memory_space<smem>>) -> (i32, i32) {
    %c0_i32 = arith.constant 0 : i32
    %c0_i32_0 = arith.constant 0 : i32
    %c0_i32_1 = arith.constant 0 : i32
    return %c0_i32, %c0_i32_0 : i32, i32
  }
  func.func @transform_8(%arg0: i32, %arg1: memref<2xi32, #tpu.memory_space<smem>>) -> (i32, i32) {
    %c0_i32 = arith.constant 0 : i32
    %c0_i32_0 = arith.constant 0 : i32
    %c0_i32_1 = arith.constant 0 : i32
    return %c0_i32, %c0_i32_0 : i32, i32
  }
  func.func @transform_9(%arg0: i32, %arg1: memref<2xi32, #tpu.memory_space<smem>>) -> (i32, i32) {
    %c0_i32 = arith.constant 0 : i32
    %c0_i32_0 = arith.constant 0 : i32
    %c0_i32_1 = arith.constant 0 : i32
    return %c0_i32, %c0_i32_0 : i32, i32
  }
  func.func @transform_10(%arg0: i32, %arg1: memref<2xi32, #tpu.memory_space<smem>>) -> (i32, i32) {
    %c0_i32 = arith.constant 0 : i32
    %c0_i32_0 = arith.constant 0 : i32
    %c0_i32_1 = arith.constant 0 : i32
    return %c0_i32, %c0_i32_0 : i32, i32
  }
  func.func @transform_11(%arg0: i32, %arg1: memref<2xi32, #tpu.memory_space<smem>>) -> (i32, i32) {
    %c0_i32 = arith.constant 0 : i32
    %c0_i32_0 = arith.constant 0 : i32
    %c0_i32_1 = arith.constant 0 : i32
    return %c0_i32, %c0_i32_0 : i32, i32
  }
  func.func @transform_12(%arg0: i32, %arg1: memref<2xi32, #tpu.memory_space<smem>>) -> (i32, i32, i32) {
    %c0_i32 = arith.constant 0 : i32
    %c0_i32_0 = arith.constant 0 : i32
    %c0_i32_1 = arith.constant 0 : i32
    return %arg0, %c0_i32, %c0_i32_0 : i32, i32, i32
  }
  func.func @transform_13(%arg0: i32, %arg1: memref<2xi32, #tpu.memory_space<smem>>) -> (i32, i32, i32) {
    %c0_i32 = arith.constant 0 : i32
    %c0_i32_0 = arith.constant 0 : i32
    %c0_i32_1 = arith.constant 0 : i32
    return %arg0, %c0_i32, %c0_i32_0 : i32, i32, i32
  }
}

</mosaic_0001>

<bundles_post_ra>
// kernel: tpu_custom_call.1
= control target key start
LH: loop header
LB: loop body
LE: loop exit
PB: predicated region body
PF: predicated region fallthrough
CT: control target
= control target key end

     0   :  { %s3306_s0 = inlined_call_operand.vmem [shape: s32[2], index: 0, kind: input, shape index: {}]   ;;  %s3307_s1 = inlined_call_operand.vmem [shape: f32[2,8,16], index: 1, kind: input, shape index: {}]   ;;  %s3308_s2 = inlined_call_operand.vmem [shape: f32[2,16,8], index: 2, kind: input, shape index: {}]   ;;  %s3309_s3 = inlined_call_operand.vmem [shape: f32[2,8,1], index: 3, kind: input, shape index: {}]   ;;  %s3310_s4 = inlined_call_operand.vmem [shape: f32[2,8,16], index: 4, kind: input, shape index: {}]   ;;  %s3311_s5 = inlined_call_operand.vmem [shape: f32[2,8,16], index: 5, kind: input, shape index: {}]   ;;  %s3312_s6 = inlined_call_operand.vmem [shape: f32[16,2], index: 6, kind: input, shape index: {}]   ;;  %s3313_s7 = inlined_call_operand.vmem [shape: f32[16,1], index: 7, kind: input, shape index: {}]   ;;  %s3314_s8 = inlined_call_operand.vmem [shape: f32[8,2], index: 8, kind: input, shape index: {}]   ;;  %s3315_s9 = inlined_call_operand.vmem [shape: f32[1,2], index: 9, kind: input, shape index: {}]   ;;  %s3316_s10 = inlined_call_operand.vmem [shape: f32[16,16], index: 10, kind: input, shape index: {}]   ;;  %s3317_s11 = inlined_call_operand.vmem [shape: f32[1,16], index: 11, kind: input, shape index: {}]   ;;  %s3318_s13 = inlined_call_operand.hbm [shape: f32[2,8,16], index: 13, kind: output, shape index: {0}]   ;;  %s3319_s14 = inlined_call_operand.hbm [shape: f32[2,1,10], index: 14, kind: output, shape index: {1}]   ;;  %s3320_s12 = inlined_call_operand.<no memory space> [shape: f32[1,1], index: 12, kind: input, shape index: {}]  }
   0x1   :  { %3321 = sst [smem:[#allocation13_spill]] %s3307_s1  ;;  %s20_s15 = sshll.u32 %s3306_s0, 4  ;;  %v24_v0 = vstv %s3320_s12  ;;  %s21_s15 = int_to_ptr.vmem [resolvable:$true] %s20_s15 }
   0x2   :  { %3322 = sst [smem:[#allocation14_spill]] %s3312_s6  ;;  %25 = vst [vmem:[#allocation4] sm:$0x1] %v24_v0  ;;  %s2686_s18 = scalar_lea.vmem %s21_s15, 16 }
   0x3   :  { %p2687_p0 = scmp.ne.s32.totalorder %s21_s15, %s2686_s18  ;;  %p2691_p1 = scmp.lt.s32.totalorder %s21_s15, %s21_s15 }
   0x4   :  { %p2692_p2 = scmp.lt.s32.totalorder %s2686_s18, %s2686_s18 }
   0x6   :  { %p2693_p3 = por %p2692_p2, %p2691_p1 }
   0x8   :  { %p2694_p4 = pnand %p2693_p3, %p2687_p0 }
   0xa   :  { %2697 = shalt.err (!%p2694_p4)  }
   0xb   :  { %s2796_s19 = smov [#allocation3]  }
   0xc   :  { %23 = dma.vmem_to_smem %s21_s15, 16, %s2796_s19, [#allocation2] }
   0xd   :  { %2770 = dma.done.wait [#allocation2], 16 }
   0xe   :  { %2771 = vsyncadd [#allocation2], 4294967280 }
   0xf   :  { %27 = sfence }
  0x10   :  { %28 = vsyncpa [#allocation6], 0 }
  0x11   :  { %30 = vsyncpa [#allocation6 + $0x1], 0 }
  0x12   :  { %31 = vsyncpa [#allocation8], 0 }
  0x13   :  { %33 = vsyncpa [#allocation8 + $0x1], 0  ;;  %s2890_s0 = smov 0   ;;  %s2892_s12 = smov 0  }
  0x14   :  { %s2894_s20 = smov 0   ;;  %s2896_s21 = smov 0  }
  0x15 LB: > { %s2911_s22 = sadd.s32 4294967295, %s2794_s21   ;;  %s2367_s23 = sadd.s32 4294967294, %s2794_s21   ;;  %s2794_s21 = sphi %s2896_s21, %s3332_s21   ;;  %s2790_s20 = sphi %s2894_s20, %s3331_s20   ;;  %s2786_s12 = sphi %s2892_s12, %s3330_s12   ;;  %s2782_s0 = sphi %s2890_s0, %s3329_s0  }
  0x16   : > { %s2915_s24 = sadd.s32 1, %s2794_s21   ;;  %s323_s25 = sadd.s32 1, %s2790_s20 }
  0x17   : > { %s320_s26 = ssub.s32 %s2794_s21, %s2915_s24  ;;  %p333_p5 = scmp.ne.s32.totalorder %s2790_s20, %s2786_s12 }
  0x18   : > { %p321_p6 = scmp.eq.s32.totalorder %s320_s26, 0  ;;  %p334_p7 = scmp.eq.s32.totalorder %s2911_s22, 1 }
  0x19   : > { %p339_p8 = scmp.ne.s32.totalorder %s2786_s12, %s2782_s0  ;;  %p340_p9 = scmp.eq.s32.totalorder %s2367_s23, 1 }
  0x1a   : > { %s2926_s27 = scalar_select %p321_p6, %s2790_s20, %s323_s25  }
  0x1b   : > { %p2928_p10 = por %p334_p7, %p333_p5  ;;  %p2932_p11 = por %p340_p9, %p339_p8 }
  0x1c   : > { %3323 = sst [smem:[#allocation12_spill]] %s2926_s27  ;;  %p2370_p12 = scmp.ge.s32.totalorder %s2794_s21, 1 }
  0x1d   : > { %p441_p13 = scmp.lt.s32.totalorder %s2794_s21, 3 }
  0x1f   : > { %p442_p0 = pnand %p2370_p12, %p441_p13 }
  0x20   : > { %p505_p1 = scmp.lt.s32.totalorder (!%p442_p0), %s2911_s22, 1  ;;  %s3326_s6 = sld [smem:[#allocation14_spill]] (!%p442_p0)  ;;  %v2797_v3 = vmov (!%p442_p0), 0.0|0.0   ;;  %vm2798_vm0 = vmmov (!%p442_p0), 0   ;;  %v2799_v5 = vmov (!%p442_p0), 0.0   ;;  %vm543_vm1 = vcmask (!%p442_p0), 130048  }
  0x21   : > { %445 = sbr.rel (%p442_p0) target bundleno = 3004 (0xbbc), region = 68  ;;  %2551 = vmatprep.subr.bf16.mxu0 (!%p442_p0), %v2797_v3  ;;  %2464 = vmatprep.mubr.msk.f32.mxu0 (!%p442_p0), %vm2798_vm0, %v2799_v5  ;;  %s3327_s1 = sld [smem:[#allocation13_spill]] (!%p442_p0)  ;;  %v927_v9 = vld [vmem:[%s3314_s8] sm:$0xff] (!%p442_p0)  ;;  %vm649_vm2 = vcmask (!%p442_p0), 64512   ;;  %v845_v16 = vld [vmem:[%s3313_s7 + $0x8] sm:$0xff] (!%p442_p0)  ;;  %v2800_v27 = vmov (!%p442_p0), 0   ;;  %v535_v56 = vlaneseq (!%p442_p0) }
  0x22   : > { %v844_v15 = vld [vmem:[%s3313_s7] sm:$0xff] (!%p442_p0)  ;;  %2659 = vset.pattern.permute.xlu1 (!%p442_p0), %v2800_v27  ;;  %v1171_v49 = vld [vmem:[%s3316_s10 + $0x8] sm:$0xff] (!%p442_p0)  ;;  %s2801_s23 = smov (!%p442_p0), 1.0   ;;  %vm1258_vm4 = vcmask (!%p442_p0), 130112   ;;  %s2806_s15 = smov (!%p442_p0), 127   ;;  %vm1507_vm9 = vcmask (!%p442_p0), 57344  }
  0x23   : > { %v2554_v17 = vpack.c.bf16 (!%p442_p0), %v845_v16, %v844_v15  ;;  %v2386_v28 = vld [vmem:[%s3315_s9] ss:$0 sm:$0xff] (!%p442_p0)  ;;  %v536_v57 = vshrl.u32 (!%p442_p0), %v535_v56, 7  ;;  %vm2085_vm10 = vcmask (!%p442_p0), 7168  }
  0x24   : > { %v1170_v48 = vld [vmem:[%s3316_s10] sm:$0xff] (!%p442_p0) }
  0x25   : > { %v2562_v50 = vpack.c.bf16 (!%p442_p0), %v1171_v49, %v1170_v48  ;;  %v2394_v59 = vld [vmem:[%s3317_s11] ss:$0 sm:$0xff] (!%p442_p0) }
  0x26   : > { %v541_v1 = vld [vmem:[%s3326_s6] sm:$0xff] (!%p442_p0)  ;;  %v542_v2 = vld [vmem:[%s3326_s6 + $0x8] sm:$0xff] (!%p442_p0) }
  0x27   : > { %v2552_v4 = vpack.c.bf16 (!%p442_p0), %v542_v2, %v541_v1 }
  0x28   : > { %s506_s18 = scalar_select %p505_p1, %s2911_s22, 1 }
  0x29   : > { %2553 = vmatpush3.bf16.msra.mxu0 %v2552_v4 }
  0x2a   : > { %s2949_s19 = sshll.u32 %s506_s18, 3  ;;  %s2413_s6 = sshll.u32 %s506_s18, 4  ;;  %2484 = vmatprep.subr.mxu0 %v927_v9 }
  0x2b   : > { %s525_s26 = scalar_lea.vmem %s3311_s5, %s2949_s19  ;;  %s521_s16 = scalar_lea.vmem %s3310_s4, %s2949_s19 }
  0x2c   : > { %v2955_v6 = vld [vmem:[%s525_s26] sm:$0xff]  ;;  %s508_s27 = scalar_lea.vmem %s3327_s1, %s2949_s19  ;;  %s513_s30 = scalar_lea.vmem %s3308_s2, %s2413_s6 }
  0x2d   : > { %617 = vxpose.xlu0.b32.start.end [1/1] (short) (narrow) %v2955_v6, 16  ;;  %v2966_v7 = vld [vmem:[%s508_s27] sm:$0xff]  ;;  %v529_v11 = vld [vmem:[%s513_s30 + $0x8] sm:$0xff]  ;;  %s517_s6 = scalar_lea.vmem %s3309_s3, %s2949_s19  ;;  %s2802_s19 = smov 120  }
  0x2e   : > { %2465 = vmatmul.mubr.msk.f32.vlgmr.msra.gmra.mrb[0].mxu0 %vm543_vm1, %v2966_v7  ;;  %2467 = vmatprep.subr.mxu1 %v2966_v7  ;;  %v2971_v8 = vld [vmem:[%s521_s16] sm:$0xff]  ;;  %s526_s16 = sld [smem:[#allocation3 + %s2911_s22]]  ;;  %s2805_s18 = smov 1  }
  0x2f   : > { %2468 = vmatpush3.msra.mxu1 %v2966_v7  ;;  %2485 = vmatpush3.msra.mxu0 %v927_v9  ;;  %v528_v10 = vld [vmem:[%s513_s30] sm:$0xff]  ;;  %v3047_v16 = vsub.f32 %v2971_v8, %v2955_v6  ;;  %s2804_s30 = smov 8  }
  0x30   : > { %2486 = vmatprep.mubr.msk.f32.mxu0 %vm649_vm2, %v528_v10  ;;  %2558 = vmatprep.subr.bf16.mxu0 %v2797_v3  ;;  %v532_v25 = vld [vmem:[%s517_s6] sm:$0xff] }
  0x31   : > { %2662 = vrcp.f32 %v532_v25 }
  0x32   : > { %731 = vxpose.xlu0.b32.start.end [1/1] (short) (narrow) %v2971_v8, 16  ;;  %2487 = vmatmul.mubr.msk.f32.vlgmr.msra.gmra.mrb[2].mxu0 %vm649_vm2, %v529_v11 }
  0x33   : > { %2493 = vmatprep.mubr.msk.f32.mxu0 %vm2798_vm0, %v2799_v5 }
  0x34   : > { %s1253_s17 = scvt.s32.f32 %s526_s16  ;;  %v537_v58 = vstv %s526_s16  ;;  %s3185_s16 = sand.u32 1, %s2786_s12  }
  0x35   : > { %vm538_vm3 = vcmp.lt.s32.totalorder %v536_v57, %v537_v58  ;;  %v2391_v58 = vld [vmem:[#allocation4] ss:$0 sm:$0xff] }
  0x36   : > { %s1254_s25 = smax.f32 %s2801_s23, %s1253_s17  ;;  %v2378_v60 = vsel %vm538_vm3, 1.0, %v2799_v5  ;;  %s2371_s17 = sshll.u32 %s3185_s16, 3 }
  0x37   : > { %v1255_v51 = vstv %s1254_s25  ;;  %s3191_s23 = scalar_lea.vmem [#allocation5], %s2371_s17  ;;  %s2409_s25 = sshll.u32 %s2911_s22, 7 }
  0x3b   : > { %v3009_v26 = vpop.eup %2662 }
  0x5b   : > { %2660 = vset.pattern.permute.xlu0 %v2800_v27 }
  0x5f   : > { %1273 = vperm.xlu0 %2660, %v3009_v26  }
  0xad   : > { %v633_v12 = vpop.trf.xlu0 }
  0xae   : > { %2469 = vmatprep.mubr.msk.f32.mxu1 %vm649_vm2, %v633_v12 }
  0xb1   : > { %v634_v13 = vpop.trf.xlu0 }
  0xb2   : > { %2470 = vmatmul.mubr.msk.f32.vlgmr.msra.gmra.mrb[0].mxu1 %vm649_vm2, %v634_v13 }
  0xb5   : > { %v747_v14 = vpop.trf.xlu0 }
  0xb6   : > { %2474 = vmatprep.mubr.msk.f32.mxu1 %vm649_vm2, %v747_v14 }
  0xb9   : > { %v748_v19 = vpop.trf.xlu0 }
 0x101   : > { %v2995_v18 = vpop.f32.mrb[0].mxu0 }
 0x102   : > { %v2466_v20 = vpop.f32.mrb[1].mxu0  ;;  %2472 = vmatprep.subr.mxu1 %v2995_v18 }
 0x103   : > { %2473 = vmatpush3.msra.mxu1 %v2995_v18 }
 0x104   : > { %2475 = vmatmul.mubr.msk.f32.vlgmr.msra.gmra.mrb[2].mxu1 %vm649_vm2, %v748_v19  ;;  %2555 = vmatprep.subr.bf16.mxu1 %v2554_v17  ;;  %v3050_v19 = vpop.permute.xlu0 %1273 }
 0x105   : > { %2557 = vmatpush3.bf16.msra.mxu1 %v2554_v17  ;;  %v2488_v21 = vpop.f32.mrb[2].mxu0  ;;  %v2803_v17 = vmov 1  }
 0x106   : > { %2561 = vmatprep.subr.bf16.mxu1 %v2797_v3  ;;  %v1007_v22 = vpop.f32.mrb[3].mxu0  ;;  %v3015_v29 = vadd.f32 %v2488_v21, %v2386_v28  ;;  %2661 = vset.pattern.permute.xlu0 %v2803_v17 }
 0x107   : > { %v3017_v30 = vadd.f32 %v2386_v28, %v1007_v22 }
 0x108   : > { %vm1035_vm8 = vcmp.ne.f32.partialorder %v3015_v29, %v3015_v29 }
 0x109   : > { %v1038_v6 = vand.u32 2147483647, %v3017_v30  ;;  %vm1034_vm7 = vcmp.ne.f32.partialorder %v3017_v30, %v3017_v30 }
 0x185   : > { %v2471_v23 = vpop.f32.mrb[0].mxu1 }
 0x186   : > { %v722_v24 = vpop.f32.mrb[1].mxu1 }
 0x187   : > { %2481 = vmatprep.mubr.msk.f32.mxu1 %vm543_vm1, %v722_v24 }
 0x188   : > { %2482 = vmatmul.mubr.msk.f32.vlgmr.msra.gmra.mrb[2].mxu1 %vm543_vm1, %v2471_v23 }
 0x189   : > { %2500 = vmatprep.mubr.msk.f32.mxu1 %vm2798_vm0, %v2799_v5  ;;  %2563 = vmatpush3.bf16.msra.mxu1 %v2562_v50 }
 0x18a   : > { %2564 = vmatprep.subr.bf16.mxu1 %v2797_v3 }
 0x25b   : > { %v2483_v31 = vpop.f32.mrb[2].mxu1 }
 0x25c   : > { %v2576_v32 = vadd.f32 %v2483_v31, %v3015_v29  ;;  %v918_v33 = vpop.f32.mrb[3].mxu1 }
 0x25d   : > { %v2577_v34 = vadd.f32 %v3017_v30, %v918_v33 }
 0x25e   : > { %v2390_v35 = vmul.f32 -1.442695, %v2576_v32 }
 0x25f   : > { %v2389_v36 = vmul.f32 -1.442695, %v2577_v34 }
 0x260   : > { %2664 = vpow2.f32 %v2390_v35 }
 0x261   : > { %2666 = vpow2.f32 %v2389_v36 }
 0x26a   : > { %v2665_v37 = vpop.eup %2664 }
 0x26b   : > { %v2667_v38 = vpop.eup %2666  ;;  %v1027_v40 = vadd.f32 1.0, %v2665_v37 }
 0x26c   : > { %v1026_v39 = vadd.f32 1.0, %v2667_v38 }
 0x26e   : > { %2668 = vrcp.f32 %v1026_v39 }
 0x26f   : > { %2670 = vrcp.f32 %v1027_v40 }
 0x270   : > { %2672 = vrcp.f32 %v1255_v51 }
 0x278   : > { %v2669_v41 = vpop.eup %2668 }
 0x279   : > { %1086 = vperm.xlu1 %2659, %v2669_v41   ;;  %v2671_v42 = vpop.eup %2670 }
 0x27a   : > { %v2673_v52 = vpop.eup %2672 }
 0x27b   : > { %2580 = vpush %v2673_v52 }
 0x27d   : > { %1091 = vperm.xlu1 %2659, %v2671_v42  }
 0x2ac   : > { %s2581_s27 = spop %2580 }
 0x2ad   : > { %v1266_v11 = vstv %s2581_s27  ;;  %s3224_s27 = scalar_lea.hbm %s3318_s13, %s2409_s25 }
 0x2f8   : > { %v1087_v43 = vpop.permute.xlu1 %1086 }
 0x2f9   : > { %v1094_v45 = vmul.f32 %v1087_v43, %v722_v24 }
 0x2fc   : > { %v1092_v44 = vpop.permute.xlu1 %1091 }
 0x2fd   : > { %v1095_v46 = vmul.f32 %v2471_v23, %v1092_v44  ;;  %v1040_v23 = vsub.f32 0.0, %v1038_v6 }
 0x2ff   : > { %v2559_v47 = vpack.c.bf16 %v1095_v46, %v1094_v45  ;;  %v1042_v25 = vmul.f32 1.442695, %v1040_v23  ;;  %v1032_v46 = vmax.f32 %v3017_v30, 0.0 }
 0x301   : > { %2560 = vmatpush3.bf16.msra.mxu0 %v2559_v47  ;;  %2674 = vpow2.f32 %v1042_v25 }
 0x304   : > { %2494 = vmatmul.mubr.msk.f32.vlgmr.msra.gmra.mrb[4].mxu0 %vm543_vm1, %v2971_v8  ;;  %v1039_v8 = vand.u32 2147483647, %v3015_v29 }
 0x306   : > { %v1041_v24 = vsub.f32 0.0, %v1039_v8 }
 0x308   : > { %v1044_v27 = vmul.f32 1.442695, %v1041_v24 }
 0x30a   : > { %2676 = vpow2.f32 %v1044_v27 }
 0x30b   : > { %v2675_v28 = vpop.eup %2674 }
 0x30c   : > { %v1046_v31 = vadd.f32 1.0, %v2675_v28  ;;  %v1049_v36 = vmul.f32 -0.5, %v2675_v28  ;;  %v1052_v40 = vand.u32 2147483647, %v2675_v28 }
 0x30e   : > { %2678 = vlog2.f32 %v1046_v31  ;;  %v1050_v37 = vadd.f32 1.0, %v1049_v36  ;;  %vm1053_vm5 = vcmp.lt.f32.partialorder %v1052_v40, 0.0004427343 }
 0x310   : > { %v1051_v42 = vmul.f32 %v2675_v28, %v1050_v37 }
 0x314   : > { %v2677_v32 = vpop.eup %2676 }
 0x315   : > { %v1055_v34 = vadd.f32 1.0, %v2677_v32  ;;  %v1058_v38 = vmul.f32 -0.5, %v2677_v32  ;;  %v1061_v45 = vand.u32 2147483647, %v2677_v32 }
 0x317   : > { %2680 = vlog2.f32 %v1055_v34  ;;  %v1059_v43 = vadd.f32 1.0, %v1058_v38  ;;  %vm1062_vm6 = vcmp.lt.f32.partialorder %v1061_v45, 0.0004427343 }
 0x318   : > { %v2679_v39 = vpop.eup %2678 }
 0x319   : > { %v1048_v41 = vmul.f32 0.6931472, %v2679_v39  ;;  %v1060_v49 = vmul.f32 %v2677_v32, %v1059_v43 }
 0x31b   : > { %v1054_v47 = vsel %vm1053_vm5, %v1051_v42, %v1048_v41 }
 0x31c   : > { %v1064_v52 = vadd.f32 %v1054_v47, %v1032_v46 }
 0x321   : > { %v2681_v44 = vpop.eup %2680 }
 0x322   : > { %v1057_v48 = vmul.f32 0.6931472, %v2681_v44 }
 0x3d7   : > { %v1165_v53 = vpop.f32.mrb[4].mxu0 }
 0x3d8   : > { %v1169_v54 = vadd.f32 %v1165_v53, %v2966_v7  ;;  %v2495_v55 = vpop.f32.mrb[5].mxu0  ;;  %v1033_v53 = vmax.f32 %v3015_v29, 0.0 }
 0x3d9   : > { %v3076_v55 = vsel %vm1034_vm7, %v3017_v30, %v1064_v52 }
 0x3da   : > { %2501 = vmatmul.mubr.msk.f32.vlgmr.msra.gmra.mrb[4].mxu1 %vm543_vm1, %v1169_v54  ;;  %v1063_v54 = vsel %vm1062_vm6, %v1060_v49, %v1057_v48 }
 0x3db   : > { %2512 = vmatprep.mubr.msk.f32.mxu1 %vm2798_vm0, %v2799_v5  ;;  %v1065_v56 = vadd.f32 %v1063_v54, %v1033_v53 }
 0x3dd   : > { %v3082_v57 = vsel %vm1035_vm8, %v3015_v29, %v1065_v56 }
 0x4ad   : > { %v1248_v61 = vpop.f32.mrb[4].mxu1 }
 0x4ae   : > { %v1249_v62 = vadd.f32 %v2394_v59, %v1248_v61  ;;  %v2502_v63 = vpop.f32.mrb[5].mxu1 }
 0x4b0   : > { %v3039_v0 = vmul.f32 %v2378_v60, %v1249_v62 }
 0x4b2   : > { %v1259_v1 = vsel %vm1258_vm4, %v3039_v0, 0.0  ;;  %v3054_v20 = vmul.f32 %v3050_v19, %v3039_v0 }
 0x4b3   : > { %v1260_v2 = vrot.slane %v1259_v1, 4 }
 0x4b4   : > { %v1520_v21 = vmul.f32 0.25, %v3054_v20 }
 0x4b5   : > { %v1261_v4 = vadd.f32 %v1260_v2, %v1259_v1 }
 0x4b7   : > { %v1262_v7 = vrot.slane %v1261_v4, 2 }
 0x4b9   : > { %v1263_v9 = vadd.f32 %v1262_v7, %v1261_v4 }
 0x4bb   : > { %v1264_v10 = vrot.slane %v1263_v9, 1 }
 0x4bd   : > { %v1265_v12 = vadd.f32 %v1264_v10, %v1263_v9 }
 0x4bf   : > { %v1267_v13 = vmul.f32 %v1266_v11, %v1265_v12 }
 0x4c1   : > { %v1268_v14 = vsub.f32 %v3039_v0, %v1267_v13 }
 0x4c3   : > { %v1269_v15 = vmul.f32 %v2378_v60, %v1268_v14 }
 0x4c5   : > { %1310 = vrot.lane.b32.xlu1 %v1269_v15, %s2802_s19 }
 0x4ee   : > { %1277 = vxpose.xlu1.b32.start.end [1/1] (short) (narrow) %v3047_v16, 16 }
 0x510   : > { %1522 = vrot.lane.b32.xlu1 %v1520_v21, %s2804_s30 }
 0x537   : > { %v1311_v22 = vpop.permute.xlu1 %1310 }
 0x538   : > { %2503 = vmatprep.subr.mxu0 %v1311_v22 }
 0x539   : > { %2504 = vmatpush3.msra.mxu0 %v1311_v22 }
 0x56e   : > { %v3060_v33 = vpop.trf.xlu1 }
 0x56f   : > { %2505 = vmatprep.mubr.msk.f32.mxu0 %vm649_vm2, %v3060_v33 }
 0x572   : > { %v3064_v35 = vpop.trf.xlu1 }
 0x573   : > { %2506 = vmatmul.mubr.msk.f32.vlgmr.msra.gmra.mrb[6].mxu0 %vm649_vm2, %v3064_v35 }
 0x574   : > { %2517 = vmatprep.mubr.msk.f32.mxu0 %vm649_vm2, %v3060_v33 }
 0x582   : > { %v1523_v50 = vpop.permute.xlu1 %1522 }
 0x583   : > { %v1525_v51 = vadd.f32 %v1523_v50, %v1269_v15 }
 0x585   : > { %1528 = vrot.lane.b32.xlu0 %v1525_v51, %s2802_s19 }
 0x589   : > { %1396 = vperm.xlu0 %2661, %v3076_v55  }
 0x58d   : > { %1401 = vperm.xlu0 %2661, %v3082_v57  }
 0x591   : > { %1074 = vrot.lane.b32.xlu0 %v2391_v58, %s2805_s18 }
 0x5f7   : > { %v1529_v59 = vpop.permute.xlu0 %1528 }
 0x5f8   : > { %2515 = vmatprep.subr.mxu0 %v1529_v59 }
 0x5f9   : > { %2516 = vmatpush3.msra.mxu0 %v1529_v59 }
 0x5fa   : > { %2518 = vmatmul.mubr.msk.f32.vlgmr.msra.gmra.mrb[8].mxu0 %vm649_vm2, %v3064_v35 }
 0x5fb   : > { %2529 = vmatprep.mubr.msk.f32.mxu0 %vm649_vm2, %v3060_v33 }
 0x608   : > { %v3089_v30 = vpop.permute.xlu0 %1396 }
 0x60c   : > { %v3091_v60 = vpop.permute.xlu0 %1401 }
 0x610   : > { %v1075_v29 = vpop.permute.xlu0 %1074 }
 0x611   : > { %v1077_v61 = vadd.f32 %v1075_v29, %v2995_v18 }
 0x613   : > { %v2392_v62 = vmul.f32 -1.442695, %v1077_v61 }
 0x615   : > { %2682 = vpow2.f32 %v2392_v62 }
 0x61f   : > { %v2683_v63 = vpop.eup %2682 }
 0x620   : > { %v1081_v1 = vadd.f32 1.0, %v2683_v63 }
 0x622   : > { %2684 = vrcp.f32 %v1081_v1 }
 0x62c   : > { %v3094_v2 = vpop.eup %2684 }
 0x62d   : > { %1482 = vperm.xlu0 %2661, %v3094_v2  }
 0x646   : > { %v2507_v4 = vpop.f32.mrb[6].mxu0 }
 0x647   : > { %v1405_v7 = vmul.f32 %v2507_v4, %v3091_v60  ;;  %v1385_v9 = vpop.f32.mrb[7].mxu0 }
 0x648   : > { %v1404_v10 = vmul.f32 %v3089_v30, %v1385_v9  ;;  %v2072_v9 = vmul.f32 0.5, %v3082_v57 }
 0x64a   : > { %v2565_v11 = vpack.c.bf16 %v1405_v7, %v1404_v10  ;;  %v2071_v10 = vmul.f32 0.5, %v3076_v55  ;;  %v1487_v55 = vsub.f32 %v3054_v20, %v3039_v0 }
 0x64c   : > { %2566 = vmatpush3.bf16.msra.mxu1 %v2565_v11 }
 0x64d   : > { %2567 = vmatprep.subr.bf16.mxu1 %v2797_v3 }
 0x64f   : > { %2513 = vmatmul.mubr.msk.f32.vlgmr.msra.gmra.mrb[6].mxu1 %vm543_vm1, %v3047_v16 }
 0x650   : > { %2524 = vmatprep.mubr.msk.f32.mxu1 %vm2798_vm0, %v2799_v5 }
 0x6ac   : > { %v3111_v17 = vpop.permute.xlu0 %1482 }
 0x6ad   : > { %v1485_v6 = vmul.f32 %v3111_v17, %v3039_v0 }
 0x6cd   : > { %v2519_v18 = vpop.f32.mrb[8].mxu0 }
 0x6ce   : > { %v1607_v12 = vmul.f32 %v2519_v18, %v3091_v60  ;;  %v1597_v13 = vpop.f32.mrb[9].mxu0 }
 0x6cf   : > { %v1606_v14 = vmul.f32 %v1597_v13, %v3089_v30 }
 0x6d1   : > { %v2568_v15 = vpack.c.bf16 %v1607_v12, %v1606_v14 }
 0x6d3   : > { %2569 = vmatpush3.bf16.msra.mxu1 %v2568_v15 }
 0x6d4   : > { %2570 = vmatprep.subr.bf16.mxu1 %v2797_v3 }
 0x6d6   : > { %2525 = vmatmul.mubr.msk.f32.vlgmr.msra.gmra.mrb[8].mxu1 %vm543_vm1, %v3047_v16 }
 0x6d7   : > { %2536 = vmatprep.mubr.msk.f32.mxu1 %vm2798_vm0, %v2799_v5 }
 0x722   : > { %v1475_v21 = vpop.f32.mrb[6].mxu1 }
 0x723   : > { %v1479_v22 = vsub.f32 0.0, %v1475_v21  ;;  %v2514_v8 = vpop.f32.mrb[7].mxu1 }
 0x725   : > { %v3115_v23 = vsub.f32 %v1479_v22, %v1485_v6 }
 0x727   : > { %v1518_v24 = vmul.f32 0.25, %v3115_v23 }
 0x729   : > { %v3119_v25 = vadd.f32 %v1518_v24, %v3039_v0 }
 0x72b   : > { %v3123_v27 = vmul.f32 %v3119_v25, %v3050_v19  ;;  %v1679_v37 = vmul.f32 %v3119_v25, %v3111_v17 }
 0x72d   : > { %v1713_v28 = vmul.f32 0.25, %v3123_v27 }
 0x72f   : > { %1715 = vrot.lane.b32.xlu0 %v1713_v28, %s2804_s30  ;;  %v1488_v28 = vmul.f32 %v1487_v55, %v1487_v55 }
 0x7a1   : > { %v1716_v31 = vpop.permute.xlu0 %1715 }
 0x7a2   : > { %v1718_v32 = vadd.f32 %v1716_v31, %v1525_v51  ;;  %v1681_v31 = vsub.f32 %v3123_v27, %v3119_v25 }
 0x7a4   : > { %1721 = vrot.lane.b32.xlu0 %v1718_v32, %s2802_s19 }
 0x7a9   : > { %v1674_v34 = vpop.f32.mrb[8].mxu1 }
 0x7aa   : > { %v1678_v36 = vsub.f32 0.0, %v1674_v34  ;;  %v2526_v38 = vpop.f32.mrb[9].mxu1 }
 0x7ac   : > { %v1680_v39 = vsub.f32 %v1678_v36, %v1679_v37  ;;  %v1489_v36 = vsel %vm649_vm2, %v1488_v28, 0.0  ;;  %v1682_v37 = vmul.f32 %v1681_v31, %v1681_v31 }
 0x7ae   : > { %v1711_v40 = vmul.f32 0.25, %v1680_v39  ;;  %v1693_v13 = vsel %vm649_vm2, %v1680_v39, 0.0 }
 0x7af   : > { %v1694_v14 = vrot.slane %v1693_v13, 4 }
 0x7b0   : > { %v3131_v41 = vadd.f32 %v1711_v40, %v3119_v25  ;;  %v1683_v40 = vsel %vm649_vm2, %v1682_v37, 0.0 }
 0x7b1   : > { %v1695_v21 = vadd.f32 %v1694_v14, %v1693_v13 }
 0x7b2   : > { %v3135_v42 = vmul.f32 %v3131_v41, %v3050_v19 }
 0x7b3   : > { %v1696_v57 = vrot.slane %v1695_v21, 2 }
 0x7b4   : > { %v1906_v43 = vmul.f32 0.25, %v3135_v42 }
 0x7b5   : > { %v1697_v8 = vadd.f32 %v1696_v57, %v1695_v21 }
 0x7b6   : > { %1908 = vrot.lane.b32.xlu0 %v1906_v43, %s2804_s30 }
 0x816   : > { %v1722_v44 = vpop.permute.xlu0 %1721 }
 0x817   : > { %2527 = vmatprep.subr.mxu0 %v1722_v44 }
 0x818   : > { %2528 = vmatpush3.msra.mxu0 %v1722_v44 }
 0x819   : > { %2530 = vmatmul.mubr.msk.f32.vlgmr.msra.gmra.mrb[10].mxu0 %vm649_vm2, %v3064_v35 }
 0x81a   : > { %2541 = vmatprep.mubr.msk.f32.mxu0 %vm649_vm2, %v3060_v33 }
 0x828   : > { %v1909_v45 = vpop.permute.xlu0 %1908 }
 0x829   : > { %v3143_v46 = vadd.f32 %v1909_v45, %v1718_v32  ;;  %v1698_v32 = vrot.slane %v1697_v8, 1 }
 0x82b   : > { %1914 = vrot.lane.b32.xlu1 %v3143_v46, %s2802_s19  ;;  %v1699_v38 = vadd.f32 %v1698_v32, %v1697_v8  ;;  %s2219_s19 = sshll.u32 %s3191_s23, 4  ;;  %s2220_s19 = int_to_ptr.vmem [resolvable:$true] %s2219_s19 }
 0x82c   : > { %s2698_s18 = scalar_lea.vmem %s2220_s19, 128 }
 0x82d   : > { %v1700_v43 = vmul.f32 %v1699_v38, %v1699_v38  ;;  %p2699_p2 = scmp.ne.s32.totalorder %s2220_s19, %s2698_s18 }
 0x82f   : > { %v1701_v0 = vsel %vm1507_vm9, %v1700_v43, 0.0  ;;  %p2700_p3 = pnand %p2699_p2, %p2928_p10 }
 0x831   : > { %p2701_p4 = pneg %p2700_p3 }
 0x89d   : > { %v1915_v47 = vpop.permute.xlu1 %1914 }
 0x89e   : > { %2539 = vmatprep.subr.mxu0 %v1915_v47 }
 0x89f   : > { %2540 = vmatpush3.msra.mxu0 %v1915_v47 }
 0x8a0   : > { %2542 = vmatmul.mubr.msk.f32.vlgmr.msra.gmra.mrb[12].mxu0 %vm649_vm2, %v3064_v35 }
 0x8ec   : > { %v2531_v48 = vpop.f32.mrb[10].mxu0 }
 0x8ed   : > { %v1800_v49 = vmul.f32 %v2531_v48, %v3091_v60  ;;  %v1790_v50 = vpop.f32.mrb[11].mxu0 }
 0x8ee   : > { %v1799_v51 = vmul.f32 %v1790_v50, %v3089_v30 }
 0x8f0   : > { %v2571_v52 = vpack.c.bf16 %v1800_v49, %v1799_v51 }
 0x8f2   : > { %2572 = vmatpush3.bf16.msra.mxu1 %v2571_v52  ;;  %v2117_v52 = vmul.f32 0.5, %v3094_v2 }
 0x8f3   : > { %2573 = vmatprep.subr.bf16.mxu1 %v2797_v3 }
 0x8f5   : > { %2537 = vmatmul.mubr.msk.f32.vlgmr.msra.gmra.mrb[10].mxu1 %vm543_vm1, %v3047_v16 }
 0x8f6   : > { %2548 = vmatprep.mubr.msk.f32.mxu1 %vm2798_vm0, %v2799_v5 }
 0x973   : > { %v2543_v33 = vpop.f32.mrb[12].mxu0 }
 0x974   : > { %v1993_v53 = vmul.f32 %v2543_v33, %v3091_v60  ;;  %v2074_v35 = vmul.f32 %v2543_v33, %v2543_v33  ;;  %v1983_v54 = vpop.f32.mrb[13].mxu0  ;;  %v1872_v60 = vmul.f32 %v3131_v41, %v3111_v17 }
 0x975   : > { %v1992_v56 = vmul.f32 %v1983_v54, %v3089_v30  ;;  %v2073_v58 = vmul.f32 %v1983_v54, %v1983_v54 }
 0x976   : > { %v2078_v59 = vsel %vm649_vm2, %v2074_v35, 0.0 }
 0x977   : > { %v2574_v29 = vpack.c.bf16 %v1993_v53, %v1992_v56  ;;  %2079 = vadd.xlane.f32.xlu1 %v2078_v59  ;;  %v2075_v3 = vsel %vm649_vm2, %v2073_v58, 0.0 }
 0x978   : > { %2076 = vadd.xlane.f32.xlu0 %v2075_v3 }
 0x979   : > { %2575 = vmatpush3.bf16.msra.mxu1 %v2574_v29 }
 0x97c   : > { %2549 = vmatmul.mubr.msk.f32.vlgmr.msra.gmra.mrb[12].mxu1 %vm543_vm1, %v3047_v16 }
 0x9c8   : > { %v1867_v5 = vpop.f32.mrb[10].mxu1 }
 0x9c9   : > { %v1871_v61 = vsub.f32 0.0, %v1867_v5  ;;  %v2538_v62 = vpop.f32.mrb[11].mxu1 }
 0x9cb   : > { %v1873_v63 = vsub.f32 %v1871_v61, %v1872_v60 }
 0x9cd   : > { %v1904_v30 = vmul.f32 0.25, %v1873_v63  ;;  %v1886_v15 = vsel %vm649_vm2, %v1873_v63, 0.0 }
 0x9ce   : > { %v1887_v22 = vrot.slane %v1886_v15, 4 }
 0x9cf   : > { %v3165_v1 = vadd.f32 %v1904_v30, %v3131_v41 }
 0x9d0   : > { %v1888_v6 = vadd.f32 %v1887_v22, %v1886_v15 }
 0x9d1   : > { %v2067_v4 = vmul.f32 %v3165_v1, %v3165_v1  ;;  %v2065_v47 = vmul.f32 %v3165_v1, %v3111_v17  ;;  %v1499_v17 = vsel %vm649_vm2, %v3115_v23, 0.0  ;;  %v1912_v58 = vmul.f32 %v3165_v1, %v3050_v19 }
 0x9d2   : > { %v1889_v24 = vrot.slane %v1888_v6, 2  ;;  %v1500_v35 = vrot.slane %v1499_v17, 4  ;;  %v1874_v19 = vsub.f32 %v3135_v42, %v3131_v41 }
 0x9d3   : > { %v2068_v7 = vsel %vm649_vm2, %v2067_v4, 0.0  ;;  %v2133_v3 = vsub.f32 %v1912_v58, %v3165_v1 }
 0x9d4   : > { %2069 = vadd.xlane.f32.xlu0 %v2068_v7  ;;  %v1890_v34 = vadd.f32 %v1889_v24, %v1888_v6  ;;  %v1501_v54 = vadd.f32 %v1500_v35, %v1499_v17 }
 0x9d5   : > { %v2134_v63 = vmul.f32 %v2133_v3, %v2133_v3 }
 0x9d6   : > { %v1891_v39 = vrot.slane %v1890_v34, 1  ;;  %v1502_v56 = vrot.slane %v1501_v54, 2 }
 0x9d7   : > { %v2135_v30 = vsel %vm649_vm2, %v2134_v63, 0.0 }
 0x9d8   : > { %v1892_v44 = vadd.f32 %v1891_v39, %v1890_v34  ;;  %v1503_v59 = vadd.f32 %v1502_v56, %v1501_v54 }
 0x9da   : > { %v1893_v20 = vmul.f32 %v1892_v44, %v1892_v44  ;;  %v1504_v60 = vrot.slane %v1503_v59, 1 }
 0x9dc   : > { %v1894_v25 = vsel %vm1507_vm9, %v1893_v20, 0.0  ;;  %v1505_v23 = vadd.f32 %v1504_v60, %v1503_v59 }
 0x9de   : > { %v1506_v4 = vmul.f32 %v1505_v23, %v1505_v23 }
 0xa04   : > { %v2080_v16 = vpop.xlane.xlu1 %2079 }
 0xa05   : > { %v2082_v11 = vmul.f32 %v2080_v16, %v2072_v9  ;;  %v2077_v18 = vpop.xlane.xlu0 %2076  ;;  %v1875_v9 = vmul.f32 %v1874_v19, %v1874_v19 }
 0xa06   : > { %v2081_v12 = vmul.f32 %v2077_v18, %v2071_v10  ;;  %v2165_v18 = vmul.f32 0.25, %v1912_v58 }
 0xa07   : > { %2100 = vrot.lane.b32.xlu1 %v2082_v11, %s2806_s15  ;;  %v1876_v16 = vsel %vm649_vm2, %v1875_v9, 0.0 }
 0xa08   : > { %2098 = vrot.lane.b32.xlu0 %v2081_v12, %s2806_s15 }
 0xa27   : > { %1490 = vadd.xlane.f32.xlu0 %v1489_v36 }
 0xa2b   : > { %1684 = vadd.xlane.f32.xlu0 %v1683_v40 }
 0xa2f   : > { %1702 = vadd.xlane.f32.xlu0 %v1701_v0 }
 0xa33   : > { %1895 = vadd.xlane.f32.xlu0 %v1894_v25 }
 0xa4f   : > { %v2060_v27 = vpop.f32.mrb[12].mxu1 }
 0xa50   : > { %v2064_v45 = vsub.f32 0.0, %v2060_v27  ;;  %v2550_v48 = vpop.f32.mrb[13].mxu1 }
 0xa52   : > { %v2066_v49 = vsub.f32 %v2064_v45, %v2065_v47 }
 0xa54   : > { %v2163_v50 = vmul.f32 0.25, %v2066_v49  ;;  %v2145_v15 = vsel %vm649_vm2, %v2066_v49, 0.0 }
 0xa55   : > { %v2146_v22 = vrot.slane %v2145_v15, 4 }
 0xa56   : > { %v2164_v51 = vadd.f32 %v2163_v50, %v3165_v1  ;;  %v1508_v1 = vsel %vm1507_vm9, %v1506_v4, 0.0 }
 0xa57   : > { %v2147_v57 = vadd.f32 %v2146_v22, %v2145_v15 }
 0xa58   : > { %2171 = vst.msk [vmem:[%s3191_s23] sm:$0xff] %vm649_vm2, %v2164_v51 }
 0xa61   : > { %v2070_v33 = vpop.xlane.xlu0 %2069 }
 0xa62   : > { %v2118_v53 = vmul.f32 %v2117_v52, %v2070_v33  ;;  %v2083_v7 = vmul.f32 0.5, %v2070_v33 }
 0xa64   : > { %2120 = vrot.lane.b32.xlu1 %v2118_v53, %s2806_s15  ;;  %v2084_v10 = vmul.f32 %v3009_v26, %v2083_v7  ;;  %v2148_v26 = vrot.slane %v2147_v57, 2  ;;  %s2807_s15 = smov [#allocation5]  }
 0xa65   : > { %s2702_s17 = sshll.u32 %s2807_s15, 4  ;;  %s2703_s17 = int_to_ptr.vmem [resolvable:$false] %s2702_s17 }
 0xa66   : > { %v2086_v11 = vsel %vm2085_vm10, %v2084_v10, 0.0  ;;  %v2149_v55 = vadd.f32 %v2148_v26, %v2147_v57  ;;  %s2704_s1 = scalar_lea.vmem %s2703_s17, 256  ;;  %p2705_p5 = scmp.lt.s32.totalorder %s2220_s19, %s2703_s17 }
 0xa67   : > { %p2706_p6 = scmp.lt.s32.totalorder %s2704_s1, %s2698_s18 }
 0xa68   : > { %v2150_v8 = vrot.slane %v2149_v55, 1 }
 0xa69   : > { %p2707_p7 = por %p2706_p6, %p2705_p5 }
 0xa6a   : > { %v2151_v24 = vadd.f32 %v2150_v8, %v2149_v55 }
 0xa6b   : > { %p2708_p8 = pnand %p2707_p7, %p2701_p4 }
 0xa6c   : > { %v2152_v32 = vmul.f32 %v2151_v24, %v2151_v24 }
 0xa6e   : > { %v2153_v34 = vsel %vm1507_vm9, %v2152_v32, 0.0 }
 0xa79   : > { %v2101_v29 = vpop.permute.xlu1 %2100 }
 0xa7a   : > { %v2105_v2 = vsel %vm2085_vm10, %v2101_v29, 0.0  ;;  %v2099_v5 = vpop.permute.xlu0 %2098 }
 0xa7b   : > { %v2104_v61 = vsel %vm2085_vm10, %v2099_v5, 0.0 }
 0xa7c   : > { %v2106_v62 = vadd.f32 %v2105_v2, %v2104_v61 }
 0xa7e   : > { %2107 = vadd.xlane.f32.xlu0 %v2106_v62 }
 0xa82   : > { %2136 = vadd.xlane.f32.xlu0 %v2135_v30 }
 0xa88   : > { %1509 = vadd.xlane.f32.xlu1 %v1508_v1 }
 0xa8c   : > { %1877 = vadd.xlane.f32.xlu1 %v1876_v16 }
 0xa90   : > { %2087 = vadd.xlane.f32.xlu1 %v2086_v11 }
 0xa98   : > { %2167 = vrot.lane.b32.xlu0 %v2165_v18, %s2804_s30  ;;  %s2202_s30 = scalar_lea.sflag [#allocation6], %s3185_s16 }
 0xab4   : > { %v1491_v12 = vpop.xlane.xlu0 %1490 }
 0xab5   : > { %v1492_v13 = vrot.slane %v1491_v12, 4 }
 0xab7   : > { %v1493_v14 = vadd.f32 %v1492_v13, %v1491_v12 }
 0xab8   : > { %v1685_v36 = vpop.xlane.xlu0 %1684 }
 0xab9   : > { %v1494_v41 = vrot.slane %v1493_v14, 2  ;;  %v1686_v40 = vrot.slane %v1685_v36, 4 }
 0xabb   : > { %v1495_v42 = vadd.f32 %v1494_v41, %v1493_v14  ;;  %v1687_v0 = vadd.f32 %v1686_v40, %v1685_v36 }
 0xabc   : > { %v1703_v37 = vpop.xlane.xlu0 %1702 }
 0xabd   : > { %v1496_v21 = vrot.slane %v1495_v42, 1  ;;  %v1704_v43 = vrot.slane %v1703_v37, 4  ;;  %v1688_v47 = vrot.slane %v1687_v0, 2 }
 0xabf   : > { %v1497_v6 = vadd.f32 %v1496_v21, %v1495_v42  ;;  %v1705_v25 = vadd.f32 %v1704_v43, %v1703_v37  ;;  %v1689_v54 = vadd.f32 %v1688_v47, %v1687_v0 }
 0xac0   : > { %v1896_v38 = vpop.xlane.xlu0 %1895 }
 0xac1   : > { %2582 = vpush %v1497_v6  ;;  %v1897_v20 = vrot.slane %v1896_v38, 4  ;;  %v1706_v51 = vrot.slane %v1705_v25, 2  ;;  %v1690_v5 = vrot.slane %v1689_v54, 1 }
 0xac3   : > { %v1898_v48 = vadd.f32 %v1897_v20, %v1896_v38  ;;  %v1707_v59 = vadd.f32 %v1706_v51, %v1705_v25  ;;  %v1691_v7 = vadd.f32 %v1690_v5, %v1689_v54 }
 0xac5   : > { %v1899_v53 = vrot.slane %v1898_v48, 2  ;;  %v1708_v23 = vrot.slane %v1707_v59, 1 }
 0xac7   : > { %v1900_v61 = vadd.f32 %v1899_v53, %v1898_v48  ;;  %v1709_v10 = vadd.f32 %v1708_v23, %v1707_v59 }
 0xac9   : > { %v1901_v1 = vrot.slane %v1900_v61, 1 }
 0xacb   : > { %v1902_v13 = vadd.f32 %v1901_v1, %v1900_v61 }
 0xad6   : > { %v2121_v28 = vpop.permute.xlu1 %2120 }
 0xad7   : > { %v2123_v31 = vsel %vm2085_vm10, %v2121_v28, 0.0 }
 0xad8   : > { %2124 = vadd.xlane.f32.xlu1 %v2123_v31 }
 0xadc   : > { %2154 = vadd.xlane.f32.xlu1 %v2153_v34 }
 0xb0b   : > { %v2108_v39 = vpop.xlane.xlu0 %2107 }
 0xb0c   : > { %v2109_v49 = vrot.slane %v2108_v39, 4 }
 0xb0e   : > { %v2110_v17 = vadd.f32 %v2109_v49, %v2108_v39 }
 0xb0f   : > { %v3215_v44 = vpop.xlane.xlu0 %2136 }
 0xb10   : > { %v2111_v2 = vrot.slane %v2110_v17, 2 }
 0xb12   : > { %v2112_v9 = vadd.f32 %v2111_v2, %v2110_v17 }
 0xb13   : > { %v2168_v27 = vpop.permute.xlu0 %2167 }
 0xb14   : > { %v2170_v45 = vadd.f32 %v2168_v27, %v3143_v46  ;;  %v2113_v14 = vrot.slane %v2112_v9, 1 }
 0xb15   : > { %v1510_v50 = vpop.xlane.xlu1 %1509 }
 0xb16   : > { %v1511_v52 = vrot.slane %v1510_v50, 4  ;;  %2172 = vst.msk [vmem:[%s3191_s23] sm:$0xff] %vm1258_vm4, %v2170_v45  ;;  %v2114_v15 = vadd.f32 %v2113_v14, %v2112_v9 }
 0xb18   : > { %v1512_v33 = vadd.f32 %v1511_v52, %v1510_v50 }
 0xb19   : > { %v1878_v35 = vpop.xlane.xlu1 %1877 }
 0xb1a   : > { %v1513_v56 = vrot.slane %v1512_v33, 2  ;;  %v1879_v58 = vrot.slane %v1878_v35, 4 }
 0xb1c   : > { %v1880_v29 = vadd.f32 %v1879_v58, %v1878_v35  ;;  %v1514_v3 = vadd.f32 %v1513_v56, %v1512_v33 }
 0xb1d   : > { %v2088_v46 = vpop.xlane.xlu1 %2087 }
 0xb1e   : > { %v1881_v60 = vrot.slane %v1880_v29, 2  ;;  %v2089_v62 = vrot.slane %v2088_v46, 4  ;;  %v1515_v63 = vrot.slane %v1514_v3, 1 }
 0xb20   : > { %v2090_v30 = vadd.f32 %v2089_v62, %v2088_v46  ;;  %v1516_v4 = vadd.f32 %v1515_v63, %v1514_v3  ;;  %v1882_v19 = vadd.f32 %v1881_v60, %v1880_v29 }
 0xb22   : > { %v2091_v16 = vrot.slane %v2090_v30, 2  ;;  %2584 = vpush %v1516_v4  ;;  %v1883_v11 = vrot.slane %v1882_v19, 1 }
 0xb23   : > { %2586 = vpush %v1691_v7 }
 0xb24   : > { %2588 = vpush %v1709_v10  ;;  %v1884_v18 = vadd.f32 %v1883_v11, %v1882_v19  ;;  %v2092_v12 = vadd.f32 %v2091_v16, %v2090_v30 }
 0xb26   : > { %2590 = vpush %v1884_v18  ;;  %v2093_v41 = vrot.slane %v2092_v12, 1 }
 0xb27   : > { %2592 = vpush %v1902_v13 }
 0xb28   : > { %v2094_v42 = vadd.f32 %v2093_v41, %v2092_v12 }
 0xb2a   : > { %2594 = vpush %v2094_v42 }
 0xb2b   : > { %2596 = vpush %v2114_v15 }
 0xb2c   : > { %2711 = shalt.err (!%p2708_p8)
}
 0xb2d   : > { %s2712_s23 = scalar_lea.hbm %s3224_s27, 128  ;;  %s2716_s26 = scalar_lea.hbm %s3318_s13, 256 }
 0xb2e   : > { %p2713_p9 = scmp.ne.s32.totalorder %s3224_s27, %s2712_s23  ;;  %p2717_p0 = scmp.lt.u32.totalorder %s3224_s27, %s3318_s13 }
 0xb2f   : > { %p2718_p1 = scmp.lt.u32.totalorder %s2716_s26, %s2712_s23  ;;  %p2720_p3 = scmp.lt.u32.totalorder %s2712_s23, %s3224_s27 }
 0xb30   : > { %p2714_p12 = pnand %p2713_p9, %p2928_p10 }
 0xb31   : > { %p2719_p2 = por %p2718_p1, %p2717_p0 }
 0xb32   : > { %p2715_p13 = pneg %p2714_p12 }
 0xb33   : > { %p2721_p4 = por %p2720_p3, %p2719_p2 }
 0xb35   : > { %p2722_p5 = pnand %p2721_p4, %p2715_p13 }
 0xb37   : > { %2725 = shalt.err (!%p2722_p5)
}
 0xb38   : > { %2604 = dma.vmem_to_hbm [thread:$0]  (%p2928_p10), %s2220_s19, 128, %s3224_s27, %s2202_s30   ;;  %v2138_v21 = vrot.slane %v3215_v44, 4  ;;  %vm2184_vm11 = vcmask 15360   ;;  %vm2186_vm12 = vcmask 23552   ;;  %vm2188_vm13 = vcmask 31744  }
 0xb39   : > { %s2583_s1 = spop %2582  ;;  %vm2190_vm14 = vcmask 39936   ;;  %vm2192_vm15 = vcmask 48128   ;;  %vm2194_vm0 = vcmask 56320   ;;  %vm2197_vm1 = vcmask 72704  }
 0xb3a   : > { %v2139_v22 = vadd.f32 %v2138_v21, %v3215_v44  ;;  %v2175_v27 = vstv %s2583_s1  ;;  %vm2199_vm3 = vcmask 73728  }
 0xb3c   : > { %v2140_v6 = vrot.slane %v2139_v22, 2 }
 0xb3e   : > { %v2141_v24 = vadd.f32 %v2140_v6, %v2139_v22 }
 0xb40   : > { %v2142_v36 = vrot.slane %v2141_v24, 1 }
 0xb42   : > { %v2143_v43 = vadd.f32 %v2142_v36, %v2141_v24 }
 0xb53   : > { %s3247_s27 = spop %2584 }
 0xb54   : > { %s2587_s19 = spop %2586  ;;  %v2179_v33 = vstv %s3247_s27  ;;  %s2207_s27 = scalar_lea.sflag [#allocation8], %s3185_s16 }
 0xb55   : > { %s3249_s30 = spop %2588  ;;  %v2176_v47 = vstv %s2587_s19 }
 0xb56   : > { %v2180_v17 = vstv %s3249_s30 }
 0xb57   : > { %s2591_s18 = spop %2590 }
 0xb58   : > { %s3251_s23 = spop %2592  ;;  %v2177_v49 = vstv %s2591_s18 }
 0xb59   : > { %v2181_v54 = vstv %s3251_s23  ;;  %s2808_s23 = smov [#allocation7]  }
 0xb5b   : > { %s2595_s25 = spop %2594 }
 0xb5c   : > { %s2597_s6 = spop %2596 }
 0xb5d   : > { %s2116_s26 = sadd.f32 %s2597_s6, %s2595_s25  ;;  %s2410_s25 = sshll.u32 %s2911_s22, 4 }
 0xb5e   : > { %s504_s6 = scalar_lea.vmem [#allocation7], %s3185_s16  ;;  %s3263_s22 = scalar_lea.hbm %s3319_s14, %s2410_s25 }
 0xb5f   : > { %v2173_v20 = vstv %s2116_s26  ;;  %s2232_s26 = sshll.u32 %s504_s6, 4  ;;  %s3265_s26 = int_to_ptr.vmem [resolvable:$true] %s2232_s26 }
 0xb60   : > { %s2726_s30 = scalar_lea.vmem %s3265_s26, 16 }
 0xb61   : > { %p2727_p6 = scmp.ne.s32.totalorder %s3265_s26, %s2726_s30 }
 0xb63   : > { %p2728_p7 = pnand %p2727_p6, %p2928_p10 }
 0xb65   : > { %v2125_v57 = vpop.xlane.xlu1 %2124  ;;  %p2729_p8 = pneg %p2728_p7 }
 0xb66   : > { %v2126_v26 = vrot.slane %v2125_v57, 4 }
 0xb68   : > { %v2127_v55 = vadd.f32 %v2126_v26, %v2125_v57 }
 0xb69   : > { %v2155_v8 = vpop.xlane.xlu1 %2154 }
 0xb6a   : > { %v2128_v28 = vrot.slane %v2127_v55, 2  ;;  %v2156_v31 = vrot.slane %v2155_v8, 4 }
 0xb6c   : > { %v2157_v32 = vadd.f32 %v2156_v31, %v2155_v8  ;;  %v2129_v34 = vadd.f32 %v2128_v28, %v2127_v55 }
 0xb6e   : > { %v2158_v37 = vrot.slane %v2157_v32, 2  ;;  %v2130_v38 = vrot.slane %v2129_v34, 1 }
 0xb70   : > { %v2159_v39 = vadd.f32 %v2158_v37, %v2157_v32  ;;  %v2131_v40 = vadd.f32 %v2130_v38, %v2129_v34 }
 0xb72   : > { %2598 = vpush %v2131_v40  ;;  %v2160_v0 = vrot.slane %v2159_v39, 1 }
 0xb73   : > { %2600 = vpush %v2143_v43 }
 0xb74   : > { %v2161_v44 = vadd.f32 %v2160_v0, %v2159_v39 }
 0xb76   : > { %2602 = vpush %v2161_v44 }
 0xba3   : > { %s2599_s15 = spop %2598 }
 0xba4   : > { %v2174_v25 = vstv %s2599_s15  ;;  %s2601_s17 = spop %2600  ;;  %s2730_s15 = sshll.u32 %s2808_s23, 4  ;;  %s2731_s15 = int_to_ptr.vmem [resolvable:$false] %s2730_s15 }
 0xba5   : > { %v2183_v45 = vsel %vm2085_vm10, %v2173_v20, %v2174_v25  ;;  %v2178_v51 = vstv %s2601_s17  ;;  %s2732_s17 = scalar_lea.vmem %s2731_s15, 32  ;;  %p2733_p9 = scmp.lt.s32.totalorder %s3265_s26, %s2731_s15 }
 0xba6   : > { %v2185_v48 = vsel %vm2184_vm11, %v2183_v45, %v2175_v27  ;;  %p2734_p12 = scmp.lt.s32.totalorder %s2732_s17, %s2726_s30 }
 0xba7   : > { %v2187_v50 = vsel %vm2186_vm12, %v2185_v48, %v2176_v47  ;;  %s2603_s1 = spop %2602 }
 0xba8   : > { %v2189_v52 = vsel %vm2188_vm13, %v2187_v50, %v2177_v49  ;;  %v2182_v58 = vstv %s2603_s1  ;;  %p2735_p13 = por %p2734_p12, %p2733_p9 }
 0xba9   : > { %v2191_v53 = vsel %vm2190_vm14, %v2189_v52, %v2178_v51 }
 0xbaa   : > { %v2193_v35 = vsel %vm2192_vm15, %v2191_v53, %v2179_v33  ;;  %p2736_p0 = pnand %p2735_p13, %p2729_p8 }
 0xbab   : > { %v2195_v56 = vsel %vm2194_vm0, %v2193_v35, %v2180_v17 }
 0xbac   : > { %v2196_v59 = vsel %vm649_vm2, %v2195_v56, %v2181_v54 }
 0xbad   : > { %v2198_v29 = vsel %vm2197_vm1, %v2196_v59, %v2182_v58 }
 0xbae   : > { %2200 = vst.msk [vmem:[%s504_s6] sm:$0x1] %vm2199_vm3, %v2198_v29 }
 0xbaf   : > { %2739 = shalt.err (!%p2736_p0)
}
 0xbb0   : > { %s2740_s16 = scalar_lea.hbm %s3263_s22, 16  ;;  %s2744_s6 = scalar_lea.hbm %s3319_s14, 32 }
 0xbb1   : > { %p2741_p1 = scmp.ne.s32.totalorder %s3263_s22, %s2740_s16  ;;  %p2745_p4 = scmp.lt.u32.totalorder %s3263_s22, %s3319_s14 }
 0xbb2   : > { %p2746_p5 = scmp.lt.u32.totalorder %s2744_s6, %s2740_s16  ;;  %p2748_p7 = scmp.lt.u32.totalorder %s2740_s16, %s3263_s22 }
 0xbb3   : > { %p2742_p2 = pnand %p2741_p1, %p2928_p10 }
 0xbb4   : > { %p2747_p6 = por %p2746_p5, %p2745_p4 }
 0xbb5   : > { %p2743_p3 = pneg %p2742_p2 }
 0xbb6   : > { %p2749_p8 = por %p2748_p7, %p2747_p6 }
 0xbb8   : > { %p2750_p9 = pnand %p2749_p8, %p2743_p3 }
 0xbba   : > { %2753 = shalt.err (!%p2750_p9)
}
 0xbbb   : > { %2605 = dma.vmem_to_hbm [thread:$0]  (%p2928_p10), %s3265_s26, 16, %s3263_s22, %s2207_s27  }
 0xbbc PF: > { %p2615_p12 = scmp.ge.s32.totalorder %s2794_s21, 2  ;;  %s2244_s30 = sand.u32 1, %s2782_s0  }
 0xbbd   : > { %s2245_s23 = scalar_lea.sflag [#allocation6], %s2244_s30 }
 0xbbe   : > { %p2609_p13 = pnand %p2615_p12, %p2932_p11 }
 0xbc0   : > { %2773 = dma.done.wait (!%p2609_p13), %s2245_s23, 128  }
 0xbc1   : > { %2775 = vsyncadd (!%p2609_p13), %s2245_s23, 4294967168  ;;  %s2254_s15 = scalar_lea.sflag [#allocation8], %s2244_s30 }
 0xbc2   : > { %2777 = dma.done.wait (!%p2609_p13), %s2254_s15, 16  }
 0xbc3   : > { %2779 = vsyncadd (!%p2609_p13), %s2254_s15, 4294967280  ;;  %s3328_s28 = sld [smem:[#allocation12_spill]]  ;;  %p36_p10 = scmp.ge.s32.totalorder %s2915_s24, 4  }
 0xbc4   : > { %s3329_s0 = smov %s2786_s12  ;;  %s3330_s12 = smov %s2790_s20 }
 0xbc5   : > { %s3332_s21 = smov %s2915_s24  ;;  %38 = sbr.rel (!%p36_p10) target bundleno = 21 (0x15), region = 132 }
 0xbc9   : > { %s3331_s20 = smov %s3328_s28 }
 0xbcc   :  { %2258 = vsyncpa [#allocation6], 1 }
 0xbcd   :  { %2260 = vsyncpa [#allocation6 + $0x1], 1 }
 0xbce   :  { %2261 = vsyncpa [#allocation8], 1 }
 0xbcf   :  { %2263 = vsyncpa [#allocation8 + $0x1], 1 }

</bundles_post_ra>
